<compile_context>
chip_gen: v7x
topology: tpu7x:2x2x1
jax: 0.10.0
libtpu: 0.0.40
codegen_flags: <defaults>
</compile_context>

<pallas_src>
import numpy as np
import jax
import jax.numpy as jnp
from jax import lax
from jax.experimental import pallas as pl
from jax.experimental.pallas import tpu as pltpu


# ------------------------------ Pallas kernel -------------------------------

def _make_kernel(C_in, C_out, H, W, slope):
    P = H * W
    H2 = (H - 1) // 2 + 1
    W2 = (W - 1) // 2 + 1
    P2 = H2 * W2

    def leaky(v):
        return jnp.where(v >= 0, v, slope * v)

    def kernel(x_ref, w1_ref, b1_ref, w2_ref, b2_ref, wr_ref, br_ref,
               sel_ref, msk_ref, o_ref):
        x = x_ref[0]                                            # (C_in, P)

        # Roll-convention probe: fwd == True  <=>  pltpu.roll matches jnp.roll.
        # (Boundary handling itself uses the precomputed msk_ref constants.)
        p_i = lax.broadcasted_iota(jnp.int32, (C_in, P), 1)
        pf = p_i.astype(jnp.float32)
        exp_fwd = jnp.where(p_i == 0, P - 1, p_i - 1).astype(jnp.float32)
        fwd = pltpu.roll(pf, shift=1, axis=1) == exp_fwd        # uniform bool (C_in, P)

        def shifted_window(v, t):
            """v[c, p] -> v[c, p + s], s = oy*W + ox, zeroed outside the image."""
            oy = t // 3 - 1
            ox = t % 3 - 1
            s = oy * W + ox
            if s == 0:
                return v
            ra = pltpu.roll(v, shift=(-s) % P, axis=1)          # jnp.roll(v, -s)
            rb = pltpu.roll(v, shift=s % P, axis=1)             # opposite convention
            shifted = jnp.where(fwd, ra, rb)
            return shifted * msk_ref[t]                         # (1, P) mask broadcast

        def conv3x3(v, w_taps_ref):
            """Stride-1, pad-1 cross-correlation: 9 channel-tap MXU matmuls."""
            acc = None
            for t in range(9):
                xs = shifted_window(v, t)                       # (C_src, P)
                part = jnp.dot(w_taps_ref[t], xs,
                               preferred_element_type=jnp.float32)
                acc = part if acc is None else acc + part
            return acc                                          # (C_dst, P) f32

        # Stride-2 subsample as a lane-dense matmul with the precomputed 0/1
        # selection matrix sel[p, q] = 1 iff p = 2*h2*W + 2*w2.
        sel = sel_ref[...]                                      # (P, P2)

        # --- skip path: weight-normed 1x1 conv, stride 2 ---------------------
        x_ds = jnp.dot(x, sel, preferred_element_type=jnp.float32)        # (C_in, P2)
        skip = jnp.dot(wr_ref[...], x_ds,
                       preferred_element_type=jnp.float32) + br_ref[...]  # (C_out, P2)

        # --- conv1: 3x3, stride 1, pad 1, untied bias, LeakyReLU -------------
        a1 = leaky(conv3x3(x, w1_ref) + b1_ref[...])                       # (C_in, P)

        # --- conv2: 3x3, stride 2, pad 1 == stride-1 conv sampled at even px -
        a2_full = conv3x3(a1, w2_ref)                                      # (C_out, P)
        a2 = jnp.dot(a2_full, sel, preferred_element_type=jnp.float32)
        a2 = leaky(a2 + b2_ref[...])                                       # (C_out, P2)

        o_ref[0] = (a2 + skip).astype(o_ref.dtype)

    return kernel


# --------------------------------- wrapper ----------------------------------

def conv_down_block_forward(x, params, *, lrelu_slope=0.2):
    """x: (N, C_in, H, W) NCHW -> (N, C_out, ceil(H/2), ceil(W/2)) NCHW."""
    (v_r, g_r, b_r), (v1, g1, b1), (v2, g2, b2) = params
    N, C_in, H, W = x.shape
    C_out = v_r.shape[0]
    H2 = (H - 1) // 2 + 1
    W2 = (W - 1) // 2 + 1
    P, P2 = H * W, H2 * W2

    def wnorm(v, g):
        # PyTorch weight_norm, dim=0: w = g * v / ||v||_{dims 1,2,3}
        norm = jnp.sqrt(jnp.sum(v * v, axis=(1, 2, 3), keepdims=True))
        return g * v / norm

    w_r = wnorm(v_r, g_r).reshape(C_out, C_in)
    # Tap-major 3x3 weights: (kh, kw, C_out, C_in) -> (9, C_out, C_in), tap t = kh*3 + kw.
    w1_taps = jnp.transpose(wnorm(v1, g1), (2, 3, 0, 1)).reshape(9, C_in, C_in)
    w2_taps = jnp.transpose(wnorm(v2, g2), (2, 3, 0, 1)).reshape(9, C_out, C_in)

    x_flat = x.reshape(N, C_in, P)            # free reshape (contiguous H,W merge)
    b1_flat = b1.reshape(C_in, P)
    b2_flat = b2.reshape(C_out, P2)
    br_col = b_r.reshape(C_out, 1)

    # Host-side constants, computed once (constant index_map keeps them resident
    # in VMEM across the whole grid instead of being rebuilt per batch step).
    pix = np.arange(P)
    ph = pix // W
    pw = pix % W
    masks = np.empty((9, 1, P), np.float32)
    for t in range(9):
        oy, ox = t // 3 - 1, t % 3 - 1
        masks[t, 0] = ((ph + oy >= 0) & (ph + oy < H)
                       & (pw + ox >= 0) & (pw + ox < W)).astype(np.float32)
    q = np.arange(P2)
    src = 2 * (q // W2) * W + 2 * (q % W2)
    sel = np.zeros((P, P2), np.float32)
    sel[src, q] = 1.0

    kernel = _make_kernel(C_in, C_out, H, W, lrelu_slope)

    flops = 2 * N * (9 * C_in * C_in * P + 9 * C_out * C_in * P
                     + (C_in + C_out) * P * P2 + C_out * C_in * P2)
    bytes_accessed = 4 * (N * C_in * P + N * C_out * P2
                          + 9 * C_in * C_in + 9 * C_out * C_in
                          + C_in * P + C_out * P2 + C_out * C_in + C_out
                          + P * P2 + 9 * P)

    out_flat = pl.pallas_call(
        kernel,
        out_shape=jax.ShapeDtypeStruct((N, C_out, P2), x.dtype),
        grid_spec=pltpu.PrefetchScalarGridSpec(
            num_scalar_prefetch=0,
            grid=(N,),
            in_specs=[
                pl.BlockSpec((1, C_in, P), lambda n: (n, 0, 0)),      # x (per batch)
                pl.BlockSpec((9, C_in, C_in), lambda n: (0, 0, 0)),   # conv1 taps
                pl.BlockSpec((C_in, P), lambda n: (0, 0)),            # conv1 untied bias
                pl.BlockSpec((9, C_out, C_in), lambda n: (0, 0, 0)),  # conv2 taps
                pl.BlockSpec((C_out, P2), lambda n: (0, 0)),          # conv2 untied bias
                pl.BlockSpec((C_out, C_in), lambda n: (0, 0)),        # resize 1x1 weight
                pl.BlockSpec((C_out, 1), lambda n: (0, 0)),           # resize bias
                pl.BlockSpec((P, P2), lambda n: (0, 0)),              # stride-2 selector
                pl.BlockSpec((9, 1, P), lambda n: (0, 0, 0)),         # per-tap masks
            ],
            out_specs=pl.BlockSpec((1, C_out, P2), lambda n: (n, 0, 0)),
        ),
        compiler_params=pltpu.CompilerParams(
            dimension_semantics=("parallel",),
        ),
        cost_estimate=pl.CostEstimate(
            flops=int(flops), transcendentals=0,
            bytes_accessed=int(bytes_accessed)),
    )(x_flat, w1_taps, b1_flat, w2_taps, b2_flat, w_r, br_col,
      jnp.asarray(sel), jnp.asarray(masks))

    return out_flat.reshape(N, C_out, H2, W2)


# ---------------------------- parameter creation ----------------------------

def make_conv_down_block_params(in_channels, out_channels, size, key):
    """Weight-normalized params mirroring ConvDownBlock's Conv2dWN / Conv2dWNUB."""
    ks = jax.random.split(key, 6)
    size2 = (size - 1) // 2 + 1

    def wn_conv(k, co, ci, ksz):
        fan_in = ci * ksz * ksz
        bound = 1.0 / np.sqrt(fan_in)
        v = jax.random.uniform(k, (co, ci, ksz, ksz), dtype=jnp.float32,
                               minval=-bound, maxval=bound)
        g = jnp.sqrt(jnp.sum(v * v, axis=(1, 2, 3), keepdims=True))  # weight_norm init
        return v, g

    v_r, g_r = wn_conv(ks[0], out_channels, in_channels, 1)
    b_r = jax.random.uniform(ks[1], (out_channels,), dtype=jnp.float32,
                             minval=-1.0, maxval=1.0) / np.sqrt(in_channels)
    v1, g1 = wn_conv(ks[2], in_channels, in_channels, 3)
    b1 = 0.05 * jax.random.normal(ks[3], (in_channels, size, size), dtype=jnp.float32)
    v2, g2 = wn_conv(ks[4], out_channels, in_channels, 3)
    b2 = 0.05 * jax.random.normal(ks[5], (out_channels, size2, size2), dtype=jnp.float32)
    return (v_r, g_r, b_r), (v1, g1, b1), (v2, g2, b2)


# -------------------------------- reference ---------------------------------

def _reference(x, params, *, lrelu_slope=0.2):
    (v_r, g_r, b_r), (v1, g1, b1), (v2, g2, b2) = params

    def wnorm(v, g):
        return g * v / jnp.sqrt(jnp.sum(v * v, axis=(1, 2, 3), keepdims=True))

    def leaky(t):
        return jnp.where(t >= 0, t, lrelu_slope * t)

    dn = ("NCHW", "OIHW", "NCHW")
    hp = lax.Precision.HIGHEST
    x_skip = lax.conv_general_dilated(x, wnorm(v_r, g_r), (2, 2), "VALID",
                                      dimension_numbers=dn, precision=hp)
    x_skip = x_skip + b_r[None, :, None, None]
    a = lax.conv_general_dilated(x, wnorm(v1, g1), (1, 1), ((1, 1), (1, 1)),
                                 dimension_numbers=dn, precision=hp)
    a = leaky(a + b1[None])
    a = lax.conv_general_dilated(a, wnorm(v2, g2), (2, 2), ((1, 1), (1, 1)),
                                 dimension_numbers=dn, precision=hp)
    a = leaky(a + b2[None])
    return a + x_skip


if __name__ == "__main__":
    N, in_channels, out_channels, size = 2, 4, 8, 16

    key = jax.random.PRNGKey(0)
    k_x, k_p = jax.random.split(key)
    x = jax.random.normal(k_x, (N, in_channels, size, size), dtype=jnp.float32)
    params = make_conv_down_block_params(in_channels, out_channels, size, k_p)

    out = conv_down_block_forward(x, params, lrelu_slope=0.2)
    out = jax.block_until_ready(out)

    ref = _reference(x, params, lrelu_slope=0.2)
    assert out.shape == (N, out_channels, size // 2, size // 2), out.shape
    max_err = float(np.max(np.abs(np.asarray(out) - np.asarray(ref))))
    assert np.allclose(np.asarray(out), np.asarray(ref), atol=1e-3, rtol=1e-3), max_err

    print("KERNEL_OK")
</pallas_src>

<mosaic_0001>
module attributes {stable_mosaic.version = 11 : i64} {
  func.func @kernel(%arg0: i32, %arg1: memref<1x4x256xf32, #tpu.memory_space<vmem>>, %arg2: memref<9x4x4xf32, #tpu.memory_space<vmem>>, %arg3: memref<4x256xf32, #tpu.memory_space<vmem>>, %arg4: memref<9x8x4xf32, #tpu.memory_space<vmem>>, %arg5: memref<8x64xf32, #tpu.memory_space<vmem>>, %arg6: memref<8x4xf32, #tpu.memory_space<vmem>>, %arg7: memref<8x1xf32, #tpu.memory_space<vmem>>, %arg8: memref<256x64xf32, #tpu.memory_space<vmem>>, %arg9: memref<9x1x256xf32, #tpu.memory_space<vmem>>, %arg10: memref<1x8x64xf32, #tpu.memory_space<vmem>>) attributes {dimension_semantics = [#tpu.dimension_semantics<parallel>], iteration_bounds = array<i64: 2>, scalar_prefetch = 0 : i64, scratch_operands = 0 : i64, tpu.core_type = #tpu.core_type<tc>, window_params = [{transform_indices = @transform_0, window_bounds = array<i64: 1, 4, 256>}, {pipeline_mode = #tpu.pipeline_mode<synchronous>, transform_indices = @transform_1, window_bounds = array<i64: 9, 4, 4>}, {pipeline_mode = #tpu.pipeline_mode<synchronous>, transform_indices = @transform_2, window_bounds = array<i64: 4, 256>}, {pipeline_mode = #tpu.pipeline_mode<synchronous>, transform_indices = @transform_3, window_bounds = array<i64: 9, 8, 4>}, {pipeline_mode = #tpu.pipeline_mode<synchronous>, transform_indices = @transform_4, window_bounds = array<i64: 8, 64>}, {pipeline_mode = #tpu.pipeline_mode<synchronous>, transform_indices = @transform_5, window_bounds = array<i64: 8, 4>}, {pipeline_mode = #tpu.pipeline_mode<synchronous>, transform_indices = @transform_6, window_bounds = array<i64: 8, 1>}, {pipeline_mode = #tpu.pipeline_mode<synchronous>, transform_indices = @transform_7, window_bounds = array<i64: 256, 64>}, {pipeline_mode = #tpu.pipeline_mode<synchronous>, transform_indices = @transform_8, window_bounds = array<i64: 9, 1, 256>}, {transform_indices = @transform_9, window_bounds = array<i64: 1, 8, 64>}]} {
    %c0 = arith.constant 0 : index
    %c0_0 = arith.constant 0 : index
    %c0_1 = arith.constant 0 : index
    %0 = vector.load %arg1[%c0, %c0_0, %c0_1] : memref<1x4x256xf32, #tpu.memory_space<vmem>>, vector<1x4x256xf32>
    %1 = vector.shape_cast %0 : vector<1x4x256xf32> to vector<4x256xf32>
    %2 = tpu.iota {dimensions = array<i32: 1>} : vector<4x256xi32>
    %3 = arith.sitofp %2 : vector<4x256xi32> to vector<4x256xf32>
    %c0_i32 = arith.constant 0 : i32
    %4 = vector.broadcast %c0_i32 : i32 to vector<4x256xi32>
    %5 = arith.cmpi eq, %2, %4 : vector<4x256xi32>
    %c1_i32 = arith.constant 1 : i32
    %6 = vector.broadcast %c1_i32 : i32 to vector<4x256xi32>
    %7 = arith.subi %2, %6 : vector<4x256xi32>
    %c255_i32 = arith.constant 255 : i32
    %8 = vector.broadcast %c255_i32 : i32 to vector<4x256xi32>
    %9 = arith.select %5, %8, %7 : vector<4x256xi1>, vector<4x256xi32>
    %10 = arith.sitofp %9 : vector<4x256xi32> to vector<4x256xf32>
    %c1_i32_2 = arith.constant 1 : i32
    %11 = tpu.dynamic_rotate %3 by %c1_i32_2 dim 1 : vector<4x256xf32>, i32 -> vector<4x256xf32>
    %12 = arith.cmpf oeq, %11, %10 : vector<4x256xf32>
    %c0_3 = arith.constant 0 : index
    %c0_4 = arith.constant 0 : index
    %13 = vector.load %arg8[%c0_3, %c0_4] : memref<256x64xf32, #tpu.memory_space<vmem>>, vector<256x64xf32>
    %cst = arith.constant dense<0.000000e+00> : vector<4x64xf32>
    %14 = tpu.matmul %1, %13, %cst {dimension_numbers = #tpu.dot_dimension_numbers<[1], [0], [0], [1], [0, 0, 1, 1], [], []>} : vector<4x256xf32>, vector<256x64xf32>, vector<4x64xf32> -> vector<4x64xf32>
    %c0_5 = arith.constant 0 : index
    %c0_6 = arith.constant 0 : index
    %15 = vector.load %arg6[%c0_5, %c0_6] : memref<8x4xf32, #tpu.memory_space<vmem>>, vector<8x4xf32>
    %cst_7 = arith.constant dense<0.000000e+00> : vector<8x64xf32>
    %16 = tpu.matmul %15, %14, %cst_7 {dimension_numbers = #tpu.dot_dimension_numbers<[1], [0], [0], [1], [0, 0, 1, 1], [], []>} : vector<8x4xf32>, vector<4x64xf32>, vector<8x64xf32> -> vector<8x64xf32>
    %c0_8 = arith.constant 0 : index
    %c0_9 = arith.constant 0 : index
    %17 = vector.load %arg7[%c0_8, %c0_9] : memref<8x1xf32, #tpu.memory_space<vmem>>, vector<8x1xf32>
    %18 = vector.broadcast %17 : vector<8x1xf32> to vector<8x64xf32>
    %19 = arith.addf %16, %18 : vector<8x64xf32>
    %c17_i32 = arith.constant 17 : i32
    %20 = tpu.dynamic_rotate %1 by %c17_i32 dim 1 : vector<4x256xf32>, i32 -> vector<4x256xf32>
    %c239_i32 = arith.constant 239 : i32
    %21 = tpu.dynamic_rotate %1 by %c239_i32 dim 1 : vector<4x256xf32>, i32 -> vector<4x256xf32>
    %22 = arith.select %12, %20, %21 : vector<4x256xi1>, vector<4x256xf32>
    %c0_10 = arith.constant 0 : index
    %c0_11 = arith.constant 0 : index
    %c0_12 = arith.constant 0 : index
    %23 = vector.load %arg9[%c0_10, %c0_11, %c0_12] : memref<9x1x256xf32, #tpu.memory_space<vmem>>, vector<1x1x256xf32>
    %24 = vector.shape_cast %23 : vector<1x1x256xf32> to vector<1x256xf32>
    %25 = vector.broadcast %24 : vector<1x256xf32> to vector<4x256xf32>
    %26 = arith.mulf %22, %25 : vector<4x256xf32>
    %c0_13 = arith.constant 0 : index
    %c0_14 = arith.constant 0 : index
    %c0_15 = arith.constant 0 : index
    %27 = vector.load %arg2[%c0_13, %c0_14, %c0_15] : memref<9x4x4xf32, #tpu.memory_space<vmem>>, vector<1x4x4xf32>
    %28 = vector.shape_cast %27 : vector<1x4x4xf32> to vector<4x4xf32>
    %cst_16 = arith.constant dense<0.000000e+00> : vector<4x256xf32>
    %29 = tpu.matmul %28, %26, %cst_16 {dimension_numbers = #tpu.dot_dimension_numbers<[1], [0], [0], [1], [0, 0, 1, 1], [], []>} : vector<4x4xf32>, vector<4x256xf32>, vector<4x256xf32> -> vector<4x256xf32>
    %c16_i32 = arith.constant 16 : i32
    %30 = tpu.dynamic_rotate %1 by %c16_i32 dim 1 : vector<4x256xf32>, i32 -> vector<4x256xf32>
    %c240_i32 = arith.constant 240 : i32
    %31 = tpu.dynamic_rotate %1 by %c240_i32 dim 1 : vector<4x256xf32>, i32 -> vector<4x256xf32>
    %32 = arith.select %12, %30, %31 : vector<4x256xi1>, vector<4x256xf32>
    %c1 = arith.constant 1 : index
    %c0_17 = arith.constant 0 : index
    %c0_18 = arith.constant 0 : index
    %33 = vector.load %arg9[%c1, %c0_17, %c0_18] : memref<9x1x256xf32, #tpu.memory_space<vmem>>, vector<1x1x256xf32>
    %34 = vector.shape_cast %33 : vector<1x1x256xf32> to vector<1x256xf32>
    %35 = vector.broadcast %34 : vector<1x256xf32> to vector<4x256xf32>
    %36 = arith.mulf %32, %35 : vector<4x256xf32>
    %c1_19 = arith.constant 1 : index
    %c0_20 = arith.constant 0 : index
    %c0_21 = arith.constant 0 : index
    %37 = vector.load %arg2[%c1_19, %c0_20, %c0_21] : memref<9x4x4xf32, #tpu.memory_space<vmem>>, vector<1x4x4xf32>
    %38 = vector.shape_cast %37 : vector<1x4x4xf32> to vector<4x4xf32>
    %cst_22 = arith.constant dense<0.000000e+00> : vector<4x256xf32>
    %39 = tpu.matmul %38, %36, %cst_22 {dimension_numbers = #tpu.dot_dimension_numbers<[1], [0], [0], [1], [0, 0, 1, 1], [], []>} : vector<4x4xf32>, vector<4x256xf32>, vector<4x256xf32> -> vector<4x256xf32>
    %40 = arith.addf %29, %39 : vector<4x256xf32>
    %c15_i32 = arith.constant 15 : i32
    %41 = tpu.dynamic_rotate %1 by %c15_i32 dim 1 : vector<4x256xf32>, i32 -> vector<4x256xf32>
    %c241_i32 = arith.constant 241 : i32
    %42 = tpu.dynamic_rotate %1 by %c241_i32 dim 1 : vector<4x256xf32>, i32 -> vector<4x256xf32>
    %43 = arith.select %12, %41, %42 : vector<4x256xi1>, vector<4x256xf32>
    %c2 = arith.constant 2 : index
    %c0_23 = arith.constant 0 : index
    %c0_24 = arith.constant 0 : index
    %44 = vector.load %arg9[%c2, %c0_23, %c0_24] : memref<9x1x256xf32, #tpu.memory_space<vmem>>, vector<1x1x256xf32>
    %45 = vector.shape_cast %44 : vector<1x1x256xf32> to vector<1x256xf32>
    %46 = vector.broadcast %45 : vector<1x256xf32> to vector<4x256xf32>
    %47 = arith.mulf %43, %46 : vector<4x256xf32>
    %c2_25 = arith.constant 2 : index
    %c0_26 = arith.constant 0 : index
    %c0_27 = arith.constant 0 : index
    %48 = vector.load %arg2[%c2_25, %c0_26, %c0_27] : memref<9x4x4xf32, #tpu.memory_space<vmem>>, vector<1x4x4xf32>
    %49 = vector.shape_cast %48 : vector<1x4x4xf32> to vector<4x4xf32>
    %cst_28 = arith.constant dense<0.000000e+00> : vector<4x256xf32>
    %50 = tpu.matmul %49, %47, %cst_28 {dimension_numbers = #tpu.dot_dimension_numbers<[1], [0], [0], [1], [0, 0, 1, 1], [], []>} : vector<4x4xf32>, vector<4x256xf32>, vector<4x256xf32> -> vector<4x256xf32>
    %51 = arith.addf %40, %50 : vector<4x256xf32>
    %c1_i32_29 = arith.constant 1 : i32
    %52 = tpu.dynamic_rotate %1 by %c1_i32_29 dim 1 : vector<4x256xf32>, i32 -> vector<4x256xf32>
    %c255_i32_30 = arith.constant 255 : i32
    %53 = tpu.dynamic_rotate %1 by %c255_i32_30 dim 1 : vector<4x256xf32>, i32 -> vector<4x256xf32>
    %54 = arith.select %12, %52, %53 : vector<4x256xi1>, vector<4x256xf32>
    %c3 = arith.constant 3 : index
    %c0_31 = arith.constant 0 : index
    %c0_32 = arith.constant 0 : index
    %55 = vector.load %arg9[%c3, %c0_31, %c0_32] : memref<9x1x256xf32, #tpu.memory_space<vmem>>, vector<1x1x256xf32>
    %56 = vector.shape_cast %55 : vector<1x1x256xf32> to vector<1x256xf32>
    %57 = vector.broadcast %56 : vector<1x256xf32> to vector<4x256xf32>
    %58 = arith.mulf %54, %57 : vector<4x256xf32>
    %c3_33 = arith.constant 3 : index
    %c0_34 = arith.constant 0 : index
    %c0_35 = arith.constant 0 : index
    %59 = vector.load %arg2[%c3_33, %c0_34, %c0_35] : memref<9x4x4xf32, #tpu.memory_space<vmem>>, vector<1x4x4xf32>
    %60 = vector.shape_cast %59 : vector<1x4x4xf32> to vector<4x4xf32>
    %cst_36 = arith.constant dense<0.000000e+00> : vector<4x256xf32>
    %61 = tpu.matmul %60, %58, %cst_36 {dimension_numbers = #tpu.dot_dimension_numbers<[1], [0], [0], [1], [0, 0, 1, 1], [], []>} : vector<4x4xf32>, vector<4x256xf32>, vector<4x256xf32> -> vector<4x256xf32>
    %62 = arith.addf %51, %61 : vector<4x256xf32>
    %c4 = arith.constant 4 : index
    %c0_37 = arith.constant 0 : index
    %c0_38 = arith.constant 0 : index
    %63 = vector.load %arg2[%c4, %c0_37, %c0_38] : memref<9x4x4xf32, #tpu.memory_space<vmem>>, vector<1x4x4xf32>
    %64 = vector.shape_cast %63 : vector<1x4x4xf32> to vector<4x4xf32>
    %cst_39 = arith.constant dense<0.000000e+00> : vector<4x256xf32>
    %65 = tpu.matmul %64, %1, %cst_39 {dimension_numbers = #tpu.dot_dimension_numbers<[1], [0], [0], [1], [0, 0, 1, 1], [], []>} : vector<4x4xf32>, vector<4x256xf32>, vector<4x256xf32> -> vector<4x256xf32>
    %66 = arith.addf %62, %65 : vector<4x256xf32>
    %c255_i32_40 = arith.constant 255 : i32
    %67 = tpu.dynamic_rotate %1 by %c255_i32_40 dim 1 : vector<4x256xf32>, i32 -> vector<4x256xf32>
    %c1_i32_41 = arith.constant 1 : i32
    %68 = tpu.dynamic_rotate %1 by %c1_i32_41 dim 1 : vector<4x256xf32>, i32 -> vector<4x256xf32>
    %69 = arith.select %12, %67, %68 : vector<4x256xi1>, vector<4x256xf32>
    %c5 = arith.constant 5 : index
    %c0_42 = arith.constant 0 : index
    %c0_43 = arith.constant 0 : index
    %70 = vector.load %arg9[%c5, %c0_42, %c0_43] : memref<9x1x256xf32, #tpu.memory_space<vmem>>, vector<1x1x256xf32>
    %71 = vector.shape_cast %70 : vector<1x1x256xf32> to vector<1x256xf32>
    %72 = vector.broadcast %71 : vector<1x256xf32> to vector<4x256xf32>
    %73 = arith.mulf %69, %72 : vector<4x256xf32>
    %c5_44 = arith.constant 5 : index
    %c0_45 = arith.constant 0 : index
    %c0_46 = arith.constant 0 : index
    %74 = vector.load %arg2[%c5_44, %c0_45, %c0_46] : memref<9x4x4xf32, #tpu.memory_space<vmem>>, vector<1x4x4xf32>
    %75 = vector.shape_cast %74 : vector<1x4x4xf32> to vector<4x4xf32>
    %cst_47 = arith.constant dense<0.000000e+00> : vector<4x256xf32>
    %76 = tpu.matmul %75, %73, %cst_47 {dimension_numbers = #tpu.dot_dimension_numbers<[1], [0], [0], [1], [0, 0, 1, 1], [], []>} : vector<4x4xf32>, vector<4x256xf32>, vector<4x256xf32> -> vector<4x256xf32>
    %77 = arith.addf %66, %76 : vector<4x256xf32>
    %c241_i32_48 = arith.constant 241 : i32
    %78 = tpu.dynamic_rotate %1 by %c241_i32_48 dim 1 : vector<4x256xf32>, i32 -> vector<4x256xf32>
    %c15_i32_49 = arith.constant 15 : i32
    %79 = tpu.dynamic_rotate %1 by %c15_i32_49 dim 1 : vector<4x256xf32>, i32 -> vector<4x256xf32>
    %80 = arith.select %12, %78, %79 : vector<4x256xi1>, vector<4x256xf32>
    %c6 = arith.constant 6 : index
    %c0_50 = arith.constant 0 : index
    %c0_51 = arith.constant 0 : index
    %81 = vector.load %arg9[%c6, %c0_50, %c0_51] : memref<9x1x256xf32, #tpu.memory_space<vmem>>, vector<1x1x256xf32>
    %82 = vector.shape_cast %81 : vector<1x1x256xf32> to vector<1x256xf32>
    %83 = vector.broadcast %82 : vector<1x256xf32> to vector<4x256xf32>
    %84 = arith.mulf %80, %83 : vector<4x256xf32>
    %c6_52 = arith.constant 6 : index
    %c0_53 = arith.constant 0 : index
    %c0_54 = arith.constant 0 : index
    %85 = vector.load %arg2[%c6_52, %c0_53, %c0_54] : memref<9x4x4xf32, #tpu.memory_space<vmem>>, vector<1x4x4xf32>
    %86 = vector.shape_cast %85 : vector<1x4x4xf32> to vector<4x4xf32>
    %cst_55 = arith.constant dense<0.000000e+00> : vector<4x256xf32>
    %87 = tpu.matmul %86, %84, %cst_55 {dimension_numbers = #tpu.dot_dimension_numbers<[1], [0], [0], [1], [0, 0, 1, 1], [], []>} : vector<4x4xf32>, vector<4x256xf32>, vector<4x256xf32> -> vector<4x256xf32>
    %88 = arith.addf %77, %87 : vector<4x256xf32>
    %c240_i32_56 = arith.constant 240 : i32
    %89 = tpu.dynamic_rotate %1 by %c240_i32_56 dim 1 : vector<4x256xf32>, i32 -> vector<4x256xf32>
    %c16_i32_57 = arith.constant 16 : i32
    %90 = tpu.dynamic_rotate %1 by %c16_i32_57 dim 1 : vector<4x256xf32>, i32 -> vector<4x256xf32>
    %91 = arith.select %12, %89, %90 : vector<4x256xi1>, vector<4x256xf32>
    %c7 = arith.constant 7 : index
    %c0_58 = arith.constant 0 : index
    %c0_59 = arith.constant 0 : index
    %92 = vector.load %arg9[%c7, %c0_58, %c0_59] : memref<9x1x256xf32, #tpu.memory_space<vmem>>, vector<1x1x256xf32>
    %93 = vector.shape_cast %92 : vector<1x1x256xf32> to vector<1x256xf32>
    %94 = vector.broadcast %93 : vector<1x256xf32> to vector<4x256xf32>
    %95 = arith.mulf %91, %94 : vector<4x256xf32>
    %c7_60 = arith.constant 7 : index
    %c0_61 = arith.constant 0 : index
    %c0_62 = arith.constant 0 : index
    %96 = vector.load %arg2[%c7_60, %c0_61, %c0_62] : memref<9x4x4xf32, #tpu.memory_space<vmem>>, vector<1x4x4xf32>
    %97 = vector.shape_cast %96 : vector<1x4x4xf32> to vector<4x4xf32>
    %cst_63 = arith.constant dense<0.000000e+00> : vector<4x256xf32>
    %98 = tpu.matmul %97, %95, %cst_63 {dimension_numbers = #tpu.dot_dimension_numbers<[1], [0], [0], [1], [0, 0, 1, 1], [], []>} : vector<4x4xf32>, vector<4x256xf32>, vector<4x256xf32> -> vector<4x256xf32>
    %99 = arith.addf %88, %98 : vector<4x256xf32>
    %c239_i32_64 = arith.constant 239 : i32
    %100 = tpu.dynamic_rotate %1 by %c239_i32_64 dim 1 : vector<4x256xf32>, i32 -> vector<4x256xf32>
    %c17_i32_65 = arith.constant 17 : i32
    %101 = tpu.dynamic_rotate %1 by %c17_i32_65 dim 1 : vector<4x256xf32>, i32 -> vector<4x256xf32>
    %102 = arith.select %12, %100, %101 : vector<4x256xi1>, vector<4x256xf32>
    %c8 = arith.constant 8 : index
    %c0_66 = arith.constant 0 : index
    %c0_67 = arith.constant 0 : index
    %103 = vector.load %arg9[%c8, %c0_66, %c0_67] : memref<9x1x256xf32, #tpu.memory_space<vmem>>, vector<1x1x256xf32>
    %104 = vector.shape_cast %103 : vector<1x1x256xf32> to vector<1x256xf32>
    %105 = vector.broadcast %104 : vector<1x256xf32> to vector<4x256xf32>
    %106 = arith.mulf %102, %105 : vector<4x256xf32>
    %c8_68 = arith.constant 8 : index
    %c0_69 = arith.constant 0 : index
    %c0_70 = arith.constant 0 : index
    %107 = vector.load %arg2[%c8_68, %c0_69, %c0_70] : memref<9x4x4xf32, #tpu.memory_space<vmem>>, vector<1x4x4xf32>
    %108 = vector.shape_cast %107 : vector<1x4x4xf32> to vector<4x4xf32>
    %cst_71 = arith.constant dense<0.000000e+00> : vector<4x256xf32>
    %109 = tpu.matmul %108, %106, %cst_71 {dimension_numbers = #tpu.dot_dimension_numbers<[1], [0], [0], [1], [0, 0, 1, 1], [], []>} : vector<4x4xf32>, vector<4x256xf32>, vector<4x256xf32> -> vector<4x256xf32>
    %110 = arith.addf %99, %109 : vector<4x256xf32>
    %c0_72 = arith.constant 0 : index
    %c0_73 = arith.constant 0 : index
    %111 = vector.load %arg3[%c0_72, %c0_73] : memref<4x256xf32, #tpu.memory_space<vmem>>, vector<4x256xf32>
    %112 = arith.addf %110, %111 : vector<4x256xf32>
    %cst_74 = arith.constant 0.000000e+00 : f32
    %113 = vector.broadcast %cst_74 : f32 to vector<4x256xf32>
    %114 = arith.cmpf oge, %112, %113 : vector<4x256xf32>
    %cst_75 = arith.constant 2.000000e-01 : f32
    %115 = vector.broadcast %cst_75 : f32 to vector<4x256xf32>
    %116 = arith.mulf %115, %112 : vector<4x256xf32>
    %117 = arith.select %114, %112, %116 : vector<4x256xi1>, vector<4x256xf32>
    %c17_i32_76 = arith.constant 17 : i32
    %118 = tpu.dynamic_rotate %117 by %c17_i32_76 dim 1 : vector<4x256xf32>, i32 -> vector<4x256xf32>
    %c239_i32_77 = arith.constant 239 : i32
    %119 = tpu.dynamic_rotate %117 by %c239_i32_77 dim 1 : vector<4x256xf32>, i32 -> vector<4x256xf32>
    %120 = arith.select %12, %118, %119 : vector<4x256xi1>, vector<4x256xf32>
    %c0_78 = arith.constant 0 : index
    %c0_79 = arith.constant 0 : index
    %c0_80 = arith.constant 0 : index
    %121 = vector.load %arg9[%c0_78, %c0_79, %c0_80] : memref<9x1x256xf32, #tpu.memory_space<vmem>>, vector<1x1x256xf32>
    %122 = vector.shape_cast %121 : vector<1x1x256xf32> to vector<1x256xf32>
    %123 = vector.broadcast %122 : vector<1x256xf32> to vector<4x256xf32>
    %124 = arith.mulf %120, %123 : vector<4x256xf32>
    %c0_81 = arith.constant 0 : index
    %c0_82 = arith.constant 0 : index
    %c0_83 = arith.constant 0 : index
    %125 = vector.load %arg4[%c0_81, %c0_82, %c0_83] : memref<9x8x4xf32, #tpu.memory_space<vmem>>, vector<1x8x4xf32>
    %126 = vector.shape_cast %125 : vector<1x8x4xf32> to vector<8x4xf32>
    %cst_84 = arith.constant dense<0.000000e+00> : vector<8x256xf32>
    %127 = tpu.matmul %126, %124, %cst_84 {dimension_numbers = #tpu.dot_dimension_numbers<[1], [0], [0], [1], [0, 0, 1, 1], [], []>} : vector<8x4xf32>, vector<4x256xf32>, vector<8x256xf32> -> vector<8x256xf32>
    %c16_i32_85 = arith.constant 16 : i32
    %128 = tpu.dynamic_rotate %117 by %c16_i32_85 dim 1 : vector<4x256xf32>, i32 -> vector<4x256xf32>
    %c240_i32_86 = arith.constant 240 : i32
    %129 = tpu.dynamic_rotate %117 by %c240_i32_86 dim 1 : vector<4x256xf32>, i32 -> vector<4x256xf32>
    %130 = arith.select %12, %128, %129 : vector<4x256xi1>, vector<4x256xf32>
    %c1_87 = arith.constant 1 : index
    %c0_88 = arith.constant 0 : index
    %c0_89 = arith.constant 0 : index
    %131 = vector.load %arg9[%c1_87, %c0_88, %c0_89] : memref<9x1x256xf32, #tpu.memory_space<vmem>>, vector<1x1x256xf32>
    %132 = vector.shape_cast %131 : vector<1x1x256xf32> to vector<1x256xf32>
    %133 = vector.broadcast %132 : vector<1x256xf32> to vector<4x256xf32>
    %134 = arith.mulf %130, %133 : vector<4x256xf32>
    %c1_90 = arith.constant 1 : index
    %c0_91 = arith.constant 0 : index
    %c0_92 = arith.constant 0 : index
    %135 = vector.load %arg4[%c1_90, %c0_91, %c0_92] : memref<9x8x4xf32, #tpu.memory_space<vmem>>, vector<1x8x4xf32>
    %136 = vector.shape_cast %135 : vector<1x8x4xf32> to vector<8x4xf32>
    %cst_93 = arith.constant dense<0.000000e+00> : vector<8x256xf32>
    %137 = tpu.matmul %136, %134, %cst_93 {dimension_numbers = #tpu.dot_dimension_numbers<[1], [0], [0], [1], [0, 0, 1, 1], [], []>} : vector<8x4xf32>, vector<4x256xf32>, vector<8x256xf32> -> vector<8x256xf32>
    %138 = arith.addf %127, %137 : vector<8x256xf32>
    %c15_i32_94 = arith.constant 15 : i32
    %139 = tpu.dynamic_rotate %117 by %c15_i32_94 dim 1 : vector<4x256xf32>, i32 -> vector<4x256xf32>
    %c241_i32_95 = arith.constant 241 : i32
    %140 = tpu.dynamic_rotate %117 by %c241_i32_95 dim 1 : vector<4x256xf32>, i32 -> vector<4x256xf32>
    %141 = arith.select %12, %139, %140 : vector<4x256xi1>, vector<4x256xf32>
    %c2_96 = arith.constant 2 : index
    %c0_97 = arith.constant 0 : index
    %c0_98 = arith.constant 0 : index
    %142 = vector.load %arg9[%c2_96, %c0_97, %c0_98] : memref<9x1x256xf32, #tpu.memory_space<vmem>>, vector<1x1x256xf32>
    %143 = vector.shape_cast %142 : vector<1x1x256xf32> to vector<1x256xf32>
    %144 = vector.broadcast %143 : vector<1x256xf32> to vector<4x256xf32>
    %145 = arith.mulf %141, %144 : vector<4x256xf32>
    %c2_99 = arith.constant 2 : index
    %c0_100 = arith.constant 0 : index
    %c0_101 = arith.constant 0 : index
    %146 = vector.load %arg4[%c2_99, %c0_100, %c0_101] : memref<9x8x4xf32, #tpu.memory_space<vmem>>, vector<1x8x4xf32>
    %147 = vector.shape_cast %146 : vector<1x8x4xf32> to vector<8x4xf32>
    %cst_102 = arith.constant dense<0.000000e+00> : vector<8x256xf32>
    %148 = tpu.matmul %147, %145, %cst_102 {dimension_numbers = #tpu.dot_dimension_numbers<[1], [0], [0], [1], [0, 0, 1, 1], [], []>} : vector<8x4xf32>, vector<4x256xf32>, vector<8x256xf32> -> vector<8x256xf32>
    %149 = arith.addf %138, %148 : vector<8x256xf32>
    %c1_i32_103 = arith.constant 1 : i32
    %150 = tpu.dynamic_rotate %117 by %c1_i32_103 dim 1 : vector<4x256xf32>, i32 -> vector<4x256xf32>
    %c255_i32_104 = arith.constant 255 : i32
    %151 = tpu.dynamic_rotate %117 by %c255_i32_104 dim 1 : vector<4x256xf32>, i32 -> vector<4x256xf32>
    %152 = arith.select %12, %150, %151 : vector<4x256xi1>, vector<4x256xf32>
    %c3_105 = arith.constant 3 : index
    %c0_106 = arith.constant 0 : index
    %c0_107 = arith.constant 0 : index
    %153 = vector.load %arg9[%c3_105, %c0_106, %c0_107] : memref<9x1x256xf32, #tpu.memory_space<vmem>>, vector<1x1x256xf32>
    %154 = vector.shape_cast %153 : vector<1x1x256xf32> to vector<1x256xf32>
    %155 = vector.broadcast %154 : vector<1x256xf32> to vector<4x256xf32>
    %156 = arith.mulf %152, %155 : vector<4x256xf32>
    %c3_108 = arith.constant 3 : index
    %c0_109 = arith.constant 0 : index
    %c0_110 = arith.constant 0 : index
    %157 = vector.load %arg4[%c3_108, %c0_109, %c0_110] : memref<9x8x4xf32, #tpu.memory_space<vmem>>, vector<1x8x4xf32>
    %158 = vector.shape_cast %157 : vector<1x8x4xf32> to vector<8x4xf32>
    %cst_111 = arith.constant dense<0.000000e+00> : vector<8x256xf32>
    %159 = tpu.matmul %158, %156, %cst_111 {dimension_numbers = #tpu.dot_dimension_numbers<[1], [0], [0], [1], [0, 0, 1, 1], [], []>} : vector<8x4xf32>, vector<4x256xf32>, vector<8x256xf32> -> vector<8x256xf32>
    %160 = arith.addf %149, %159 : vector<8x256xf32>
    %c4_112 = arith.constant 4 : index
    %c0_113 = arith.constant 0 : index
    %c0_114 = arith.constant 0 : index
    %161 = vector.load %arg4[%c4_112, %c0_113, %c0_114] : memref<9x8x4xf32, #tpu.memory_space<vmem>>, vector<1x8x4xf32>
    %162 = vector.shape_cast %161 : vector<1x8x4xf32> to vector<8x4xf32>
    %cst_115 = arith.constant dense<0.000000e+00> : vector<8x256xf32>
    %163 = tpu.matmul %162, %117, %cst_115 {dimension_numbers = #tpu.dot_dimension_numbers<[1], [0], [0], [1], [0, 0, 1, 1], [], []>} : vector<8x4xf32>, vector<4x256xf32>, vector<8x256xf32> -> vector<8x256xf32>
    %164 = arith.addf %160, %163 : vector<8x256xf32>
    %c255_i32_116 = arith.constant 255 : i32
    %165 = tpu.dynamic_rotate %117 by %c255_i32_116 dim 1 : vector<4x256xf32>, i32 -> vector<4x256xf32>
    %c1_i32_117 = arith.constant 1 : i32
    %166 = tpu.dynamic_rotate %117 by %c1_i32_117 dim 1 : vector<4x256xf32>, i32 -> vector<4x256xf32>
    %167 = arith.select %12, %165, %166 : vector<4x256xi1>, vector<4x256xf32>
    %c5_118 = arith.constant 5 : index
    %c0_119 = arith.constant 0 : index
    %c0_120 = arith.constant 0 : index
    %168 = vector.load %arg9[%c5_118, %c0_119, %c0_120] : memref<9x1x256xf32, #tpu.memory_space<vmem>>, vector<1x1x256xf32>
    %169 = vector.shape_cast %168 : vector<1x1x256xf32> to vector<1x256xf32>
    %170 = vector.broadcast %169 : vector<1x256xf32> to vector<4x256xf32>
    %171 = arith.mulf %167, %170 : vector<4x256xf32>
    %c5_121 = arith.constant 5 : index
    %c0_122 = arith.constant 0 : index
    %c0_123 = arith.constant 0 : index
    %172 = vector.load %arg4[%c5_121, %c0_122, %c0_123] : memref<9x8x4xf32, #tpu.memory_space<vmem>>, vector<1x8x4xf32>
    %173 = vector.shape_cast %172 : vector<1x8x4xf32> to vector<8x4xf32>
    %cst_124 = arith.constant dense<0.000000e+00> : vector<8x256xf32>
    %174 = tpu.matmul %173, %171, %cst_124 {dimension_numbers = #tpu.dot_dimension_numbers<[1], [0], [0], [1], [0, 0, 1, 1], [], []>} : vector<8x4xf32>, vector<4x256xf32>, vector<8x256xf32> -> vector<8x256xf32>
    %175 = arith.addf %164, %174 : vector<8x256xf32>
    %c241_i32_125 = arith.constant 241 : i32
    %176 = tpu.dynamic_rotate %117 by %c241_i32_125 dim 1 : vector<4x256xf32>, i32 -> vector<4x256xf32>
    %c15_i32_126 = arith.constant 15 : i32
    %177 = tpu.dynamic_rotate %117 by %c15_i32_126 dim 1 : vector<4x256xf32>, i32 -> vector<4x256xf32>
    %178 = arith.select %12, %176, %177 : vector<4x256xi1>, vector<4x256xf32>
    %c6_127 = arith.constant 6 : index
    %c0_128 = arith.constant 0 : index
    %c0_129 = arith.constant 0 : index
    %179 = vector.load %arg9[%c6_127, %c0_128, %c0_129] : memref<9x1x256xf32, #tpu.memory_space<vmem>>, vector<1x1x256xf32>
    %180 = vector.shape_cast %179 : vector<1x1x256xf32> to vector<1x256xf32>
    %181 = vector.broadcast %180 : vector<1x256xf32> to vector<4x256xf32>
    %182 = arith.mulf %178, %181 : vector<4x256xf32>
    %c6_130 = arith.constant 6 : index
    %c0_131 = arith.constant 0 : index
    %c0_132 = arith.constant 0 : index
    %183 = vector.load %arg4[%c6_130, %c0_131, %c0_132] : memref<9x8x4xf32, #tpu.memory_space<vmem>>, vector<1x8x4xf32>
    %184 = vector.shape_cast %183 : vector<1x8x4xf32> to vector<8x4xf32>
    %cst_133 = arith.constant dense<0.000000e+00> : vector<8x256xf32>
    %185 = tpu.matmul %184, %182, %cst_133 {dimension_numbers = #tpu.dot_dimension_numbers<[1], [0], [0], [1], [0, 0, 1, 1], [], []>} : vector<8x4xf32>, vector<4x256xf32>, vector<8x256xf32> -> vector<8x256xf32>
    %186 = arith.addf %175, %185 : vector<8x256xf32>
    %c240_i32_134 = arith.constant 240 : i32
    %187 = tpu.dynamic_rotate %117 by %c240_i32_134 dim 1 : vector<4x256xf32>, i32 -> vector<4x256xf32>
    %c16_i32_135 = arith.constant 16 : i32
    %188 = tpu.dynamic_rotate %117 by %c16_i32_135 dim 1 : vector<4x256xf32>, i32 -> vector<4x256xf32>
    %189 = arith.select %12, %187, %188 : vector<4x256xi1>, vector<4x256xf32>
    %c7_136 = arith.constant 7 : index
    %c0_137 = arith.constant 0 : index
    %c0_138 = arith.constant 0 : index
    %190 = vector.load %arg9[%c7_136, %c0_137, %c0_138] : memref<9x1x256xf32, #tpu.memory_space<vmem>>, vector<1x1x256xf32>
    %191 = vector.shape_cast %190 : vector<1x1x256xf32> to vector<1x256xf32>
    %192 = vector.broadcast %191 : vector<1x256xf32> to vector<4x256xf32>
    %193 = arith.mulf %189, %192 : vector<4x256xf32>
    %c7_139 = arith.constant 7 : index
    %c0_140 = arith.constant 0 : index
    %c0_141 = arith.constant 0 : index
    %194 = vector.load %arg4[%c7_139, %c0_140, %c0_141] : memref<9x8x4xf32, #tpu.memory_space<vmem>>, vector<1x8x4xf32>
    %195 = vector.shape_cast %194 : vector<1x8x4xf32> to vector<8x4xf32>
    %cst_142 = arith.constant dense<0.000000e+00> : vector<8x256xf32>
    %196 = tpu.matmul %195, %193, %cst_142 {dimension_numbers = #tpu.dot_dimension_numbers<[1], [0], [0], [1], [0, 0, 1, 1], [], []>} : vector<8x4xf32>, vector<4x256xf32>, vector<8x256xf32> -> vector<8x256xf32>
    %197 = arith.addf %186, %196 : vector<8x256xf32>
    %c239_i32_143 = arith.constant 239 : i32
    %198 = tpu.dynamic_rotate %117 by %c239_i32_143 dim 1 : vector<4x256xf32>, i32 -> vector<4x256xf32>
    %c17_i32_144 = arith.constant 17 : i32
    %199 = tpu.dynamic_rotate %117 by %c17_i32_144 dim 1 : vector<4x256xf32>, i32 -> vector<4x256xf32>
    %200 = arith.select %12, %198, %199 : vector<4x256xi1>, vector<4x256xf32>
    %c8_145 = arith.constant 8 : index
    %c0_146 = arith.constant 0 : index
    %c0_147 = arith.constant 0 : index
    %201 = vector.load %arg9[%c8_145, %c0_146, %c0_147] : memref<9x1x256xf32, #tpu.memory_space<vmem>>, vector<1x1x256xf32>
    %202 = vector.shape_cast %201 : vector<1x1x256xf32> to vector<1x256xf32>
    %203 = vector.broadcast %202 : vector<1x256xf32> to vector<4x256xf32>
    %204 = arith.mulf %200, %203 : vector<4x256xf32>
    %c8_148 = arith.constant 8 : index
    %c0_149 = arith.constant 0 : index
    %c0_150 = arith.constant 0 : index
    %205 = vector.load %arg4[%c8_148, %c0_149, %c0_150] : memref<9x8x4xf32, #tpu.memory_space<vmem>>, vector<1x8x4xf32>
    %206 = vector.shape_cast %205 : vector<1x8x4xf32> to vector<8x4xf32>
    %cst_151 = arith.constant dense<0.000000e+00> : vector<8x256xf32>
    %207 = tpu.matmul %206, %204, %cst_151 {dimension_numbers = #tpu.dot_dimension_numbers<[1], [0], [0], [1], [0, 0, 1, 1], [], []>} : vector<8x4xf32>, vector<4x256xf32>, vector<8x256xf32> -> vector<8x256xf32>
    %208 = arith.addf %197, %207 : vector<8x256xf32>
    %cst_152 = arith.constant dense<0.000000e+00> : vector<8x64xf32>
    %209 = tpu.matmul %208, %13, %cst_152 {dimension_numbers = #tpu.dot_dimension_numbers<[1], [0], [0], [1], [0, 0, 1, 1], [], []>} : vector<8x256xf32>, vector<256x64xf32>, vector<8x64xf32> -> vector<8x64xf32>
    %c0_153 = arith.constant 0 : index
    %c0_154 = arith.constant 0 : index
    %210 = vector.load %arg5[%c0_153, %c0_154] : memref<8x64xf32, #tpu.memory_space<vmem>>, vector<8x64xf32>
    %211 = arith.addf %209, %210 : vector<8x64xf32>
    %cst_155 = arith.constant 0.000000e+00 : f32
    %212 = vector.broadcast %cst_155 : f32 to vector<8x64xf32>
    %213 = arith.cmpf oge, %211, %212 : vector<8x64xf32>
    %cst_156 = arith.constant 2.000000e-01 : f32
    %214 = vector.broadcast %cst_156 : f32 to vector<8x64xf32>
    %215 = arith.mulf %214, %211 : vector<8x64xf32>
    %216 = arith.select %213, %211, %215 : vector<8x64xi1>, vector<8x64xf32>
    %217 = arith.addf %216, %19 : vector<8x64xf32>
    %c0_157 = arith.constant 0 : index
    %c0_158 = arith.constant 0 : index
    %c0_159 = arith.constant 0 : index
    %218 = vector.load %arg10[%c0_157, %c0_158, %c0_159] : memref<1x8x64xf32, #tpu.memory_space<vmem>>, vector<1x8x64xf32>
    %219 = vector.shape_cast %218 : vector<1x8x64xf32> to vector<8x64xf32>
    %220 = vector.shape_cast %217 : vector<8x64xf32> to vector<1x8x64xf32>
    tpu.vector_store %arg10[%c0_157, %c0_158, %c0_159], %220 {strides = array<i32>} : memref<1x8x64xf32, #tpu.memory_space<vmem>>, vector<1x8x64xf32>,
    return
  }
  func.func @transform_0(%arg0: i32) -> (i32, i32, i32) {
    %c0_i32 = arith.constant 0 : i32
    %c0_i32_0 = arith.constant 0 : i32
    %c0_i32_1 = arith.constant 0 : i32
    return %arg0, %c0_i32, %c0_i32_0 : i32, i32, i32
  }
  func.func @transform_1(%arg0: i32) -> (i32, i32, i32) {
    %c0_i32 = arith.constant 0 : i32
    %c0_i32_0 = arith.constant 0 : i32
    %c0_i32_1 = arith.constant 0 : i32
    %c0_i32_2 = arith.constant 0 : i32
    return %c0_i32, %c0_i32_0, %c0_i32_1 : i32, i32, i32
  }
  func.func @transform_2(%arg0: i32) -> (i32, i32) {
    %c0_i32 = arith.constant 0 : i32
    %c0_i32_0 = arith.constant 0 : i32
    %c0_i32_1 = arith.constant 0 : i32
    return %c0_i32, %c0_i32_0 : i32, i32
  }
  func.func @transform_3(%arg0: i32) -> (i32, i32, i32) {
    %c0_i32 = arith.constant 0 : i32
    %c0_i32_0 = arith.constant 0 : i32
    %c0_i32_1 = arith.constant 0 : i32
    %c0_i32_2 = arith.constant 0 : i32
    return %c0_i32, %c0_i32_0, %c0_i32_1 : i32, i32, i32
  }
  func.func @transform_4(%arg0: i32) -> (i32, i32) {
    %c0_i32 = arith.constant 0 : i32
    %c0_i32_0 = arith.constant 0 : i32
    %c0_i32_1 = arith.constant 0 : i32
    return %c0_i32, %c0_i32_0 : i32, i32
  }
  func.func @transform_5(%arg0: i32) -> (i32, i32) {
    %c0_i32 = arith.constant 0 : i32
    %c0_i32_0 = arith.constant 0 : i32
    %c0_i32_1 = arith.constant 0 : i32
    return %c0_i32, %c0_i32_0 : i32, i32
  }
  func.func @transform_6(%arg0: i32) -> (i32, i32) {
    %c0_i32 = arith.constant 0 : i32
    %c0_i32_0 = arith.constant 0 : i32
    %c0_i32_1 = arith.constant 0 : i32
    return %c0_i32, %c0_i32_0 : i32, i32
  }
  func.func @transform_7(%arg0: i32) -> (i32, i32) {
    %c0_i32 = arith.constant 0 : i32
    %c0_i32_0 = arith.constant 0 : i32
    %c0_i32_1 = arith.constant 0 : i32
    return %c0_i32, %c0_i32_0 : i32, i32
  }
  func.func @transform_8(%arg0: i32) -> (i32, i32, i32) {
    %c0_i32 = arith.constant 0 : i32
    %c0_i32_0 = arith.constant 0 : i32
    %c0_i32_1 = arith.constant 0 : i32
    %c0_i32_2 = arith.constant 0 : i32
    return %c0_i32, %c0_i32_0, %c0_i32_1 : i32, i32, i32
  }
  func.func @transform_9(%arg0: i32) -> (i32, i32, i32) {
    %c0_i32 = arith.constant 0 : i32
    %c0_i32_0 = arith.constant 0 : i32
    %c0_i32_1 = arith.constant 0 : i32
    return %arg0, %c0_i32, %c0_i32_0 : i32, i32, i32
  }
}

</mosaic_0001>

<bundles_post_ra>
// kernel: tpu_custom_call.1
= control target key start
LH: loop header
LB: loop body
LE: loop exit
PB: predicated region body
PF: predicated region fallthrough
CT: control target
= control target key end

     0   :  { %14 = vsyncpa [#allocation3], 0  ;;  %s3756_s0 = inlined_call_operand.vmem [shape: f32[2,4,256], index: 0, kind: input, shape index: {}]   ;;  %s3757_s1 = inlined_call_operand.vmem [shape: f32[9,4,4], index: 1, kind: input, shape index: {}]   ;;  %s3758_s2 = inlined_call_operand.vmem [shape: f32[4,256], index: 2, kind: input, shape index: {}]   ;;  %s3759_s3 = inlined_call_operand.vmem [shape: f32[9,8,4], index: 3, kind: input, shape index: {}]   ;;  %s3760_s4 = inlined_call_operand.vmem [shape: f32[8,64], index: 4, kind: input, shape index: {}]   ;;  %s3761_s5 = inlined_call_operand.vmem [shape: f32[8,4], index: 5, kind: input, shape index: {}]   ;;  %s3762_s6 = inlined_call_operand.vmem [shape: f32[8,1], index: 6, kind: input, shape index: {}]   ;;  %s3763_s7 = inlined_call_operand.vmem [shape: f32[256,64], index: 7, kind: input, shape index: {}]   ;;  %s3764_s8 = inlined_call_operand.vmem [shape: f32[9,1,256], index: 8, kind: input, shape index: {}]   ;;  %s3765_s9 = inlined_call_operand.hbm [shape: f32[2,8,64], index: 9, kind: output, shape index: {}]  }
   0x1   :  { %16 = vsyncpa [#allocation3 + $0x1], 0  ;;  %s2921_s30 = smov 0   ;;  %s2923_s10 = smov 0  }
   0x2   :  { %s2925_s11 = smov 0   ;;  %s2927_s12 = smov 0  }
   0x3 LB: > { %s2942_s13 = sadd.s32 4294967295, %s2857_s12   ;;  %s2476_s14 = sadd.s32 4294967294, %s2857_s12   ;;  %s2857_s12 = sphi %s2927_s12, %s3778_s12   ;;  %s2853_s11 = sphi %s2925_s11, %s3777_s11   ;;  %s2849_s10 = sphi %s2923_s10, %s3776_s10   ;;  %s2845_s30 = sphi %s2921_s30, %s3775_s30  }
   0x4   : > { %s2946_s15 = sadd.s32 1, %s2857_s12   ;;  %s223_s16 = sadd.s32 1, %s2853_s11 }
   0x5   : > { %s220_s17 = ssub.s32 %s2857_s12, %s2946_s15  ;;  %p233_p0 = scmp.ne.s32.totalorder %s2853_s11, %s2849_s10 }
   0x6   : > { %p221_p1 = scmp.eq.s32.totalorder %s220_s17, 0  ;;  %p234_p2 = scmp.eq.s32.totalorder %s2942_s13, 1 }
   0x7   : > { %p239_p3 = scmp.ne.s32.totalorder %s2849_s10, %s2845_s30  ;;  %p240_p4 = scmp.eq.s32.totalorder %s2476_s14, 1 }
   0x8   : > { %s2957_s18 = scalar_select %p221_p1, %s2853_s11, %s223_s16  }
   0x9   : > { %p2959_p5 = por %p234_p2, %p233_p0  ;;  %p2963_p6 = por %p240_p4, %p239_p3 }
   0xa   : > { %p2479_p7 = scmp.ge.s32.totalorder %s2857_s12, 1  ;;  %p290_p8 = scmp.lt.s32.totalorder %s2857_s12, 3 }
   0xc   : > { %p291_p9 = pnand %p2479_p7, %p290_p8 }
   0xd   : > { %v370_v0 = vld [vmem:[%s3763_s7 + $0x80] sm:$0xff] (!%p291_p9)  ;;  %v371_v1 = vld [vmem:[%s3763_s7 + $0x88] sm:$0xff] (!%p291_p9)  ;;  %p326_p10 = scmp.lt.s32.totalorder (!%p291_p9), %s2942_s13, 1  ;;  %v332_v3 = vlaneseq (!%p291_p9)  ;;  %v372_v6 = vld [vmem:[%s3763_s7 + $0x90] sm:$0xff] (!%p291_p9)  ;;  %s2860_s28 = smov (!%p291_p9), 16   ;;  %v2867_v55 = vmov (!%p291_p9), 0.0  }
   0xe   : > { %294 = sbr.rel (%p291_p9) target bundleno = 1189 (0x4a5), region = 56  ;;  %v354_v2 = vld [vmem:[%s3763_s7] sm:$0xff] (!%p291_p9)  ;;  %v2979_v4 = vpack.c.bf16 (!%p291_p9), %v371_v1, %v370_v0  ;;  %v355_v5 = vld [vmem:[%s3763_s7 + $0x8] sm:$0xff] (!%p291_p9)  ;;  %v373_v7 = vld [vmem:[%s3763_s7 + $0x98] sm:$0xff] (!%p291_p9)  ;;  %s2862_s25 = smov (!%p291_p9), 17   ;;  %2641 = vmatprep.subr.mxu1 (!%p291_p9), %v2867_v55  ;;  %vm2868_vm0 = vmmov (!%p291_p9), 0  }
   0xf   : > { %v2990_v8 = vpack.c.bf16 (!%p291_p9), %v355_v5, %v354_v2  ;;  %v2992_v9 = vpack.c.bf16 (!%p291_p9), %v373_v7, %v372_v6  ;;  %v356_v10 = vld [vmem:[%s3763_s7 + $0x10] sm:$0xff] (!%p291_p9)  ;;  %v357_v11 = vld [vmem:[%s3763_s7 + $0x18] sm:$0xff] (!%p291_p9)  ;;  %v374_v12 = vld [vmem:[%s3763_s7 + $0xa0] sm:$0xff] (!%p291_p9)  ;;  %v3005_v13 = vand.u32 (!%p291_p9), 127, %v332_v3  ;;  %s2864_s21 = smov (!%p291_p9), 15   ;;  %s2865_s22 = smov (!%p291_p9), 113   ;;  %2643 = vmatprep.mubr.msk.f32.mxu1 (!%p291_p9), %vm2868_vm0, %v2867_v55 }
  0x10   : > { %2647 = vmatprep.subr.bf16.mxu0 (!%p291_p9), %v2979_v4  ;;  %v375_v14 = vld [vmem:[%s3763_s7 + $0xa8] sm:$0xff] (!%p291_p9)  ;;  %v3012_v15 = vpack.c.bf16 (!%p291_p9), %v357_v11, %v356_v10  ;;  %v358_v19 = vld [vmem:[%s3763_s7 + $0x20] sm:$0xff] (!%p291_p9)  ;;  %v376_v21 = vld [vmem:[%s3763_s7 + $0xb0] sm:$0xff] (!%p291_p9)  ;;  %s2866_s23 = smov (!%p291_p9), 127   ;;  %v563_v11 = vshrl.u32 (!%p291_p9), %v332_v3, 7  ;;  %vm470_vm11 = vcmask (!%p291_p9), 1043456  }
  0x11   : > { %2649 = vmatpush3.bf16.msra.mxu0 (!%p291_p9), %v2990_v8  ;;  %v335_v16 = vcvt.s32.f32 (!%p291_p9), %v3005_v13  ;;  %v3016_v17 = vadd.s32 (!%p291_p9), 128, %v3005_v13  ;;  %v3019_v18 = vpack.c.bf16 (!%p291_p9), %v375_v14, %v374_v12  ;;  %v359_v20 = vld [vmem:[%s3763_s7 + $0x28] sm:$0xff] (!%p291_p9)  ;;  %v377_v22 = vld [vmem:[%s3763_s7 + $0xb8] sm:$0xff] (!%p291_p9)  ;;  %v360_v26 = vld [vmem:[%s3763_s7 + $0x30] sm:$0xff] (!%p291_p9)  ;;  %v2483_v2 = vadd.s32 (!%p291_p9), 4294967295, %v3005_v13  ;;  %s323_s24 = sand.u32 (!%p291_p9), 1, %s2849_s10  }
  0x12   : > { %2651 = vmatprep.subr.bf16.mxu0 (!%p291_p9), %v2992_v9  ;;  %v3039_v24 = vpack.c.bf16 (!%p291_p9), %v359_v20, %v358_v19  ;;  %v3042_v25 = vpack.c.bf16 (!%p291_p9), %v377_v22, %v376_v21  ;;  %v361_v27 = vld [vmem:[%s3763_s7 + $0x38] sm:$0xff] (!%p291_p9)  ;;  %v378_v28 = vld [vmem:[%s3763_s7 + $0xc0] sm:$0xff] (!%p291_p9)  ;;  %v379_v29 = vld [vmem:[%s3763_s7 + $0xc8] sm:$0xff] (!%p291_p9)  ;;  %vm337_vm1 = vcmp.eq.s32.totalorder (!%p291_p9), %v3005_v13, 0  ;;  %vm349_vm2 = vcmp.lt.s32.totalorder (!%p291_p9), %v3005_v13, 1  ;;  %s2480_s26 = sshll.u32 (!%p291_p9), %s323_s24, 3 }
  0x13   : > { %v336_v23 = vcvt.s32.f32 (!%p291_p9), %v3016_v17  ;;  %v3066_v32 = vpack.c.bf16 (!%p291_p9), %v361_v27, %v360_v26  ;;  %v3069_v33 = vpack.c.bf16 (!%p291_p9), %v379_v29, %v378_v28  ;;  %v362_v34 = vld [vmem:[%s3763_s7 + $0x40] sm:$0xff] (!%p291_p9)  ;;  %v363_v35 = vld [vmem:[%s3763_s7 + $0x48] sm:$0xff] (!%p291_p9)  ;;  %v380_v36 = vld [vmem:[%s3763_s7 + $0xd0] sm:$0xff] (!%p291_p9)  ;;  %v2484_v5 = vadd.s32 (!%p291_p9), 4294967295, %v3016_v17  ;;  %s2870_s17 = smov (!%p291_p9), [#allocation2]  }
  0x14   : > { %v381_v37 = vld [vmem:[%s3763_s7 + $0xd8] sm:$0xff] (!%p291_p9)  ;;  %v3089_v38 = vpack.c.bf16 (!%p291_p9), %v363_v35, %v362_v34  ;;  %v364_v40 = vld [vmem:[%s3763_s7 + $0x50] sm:$0xff] (!%p291_p9)  ;;  %v382_v42 = vld [vmem:[%s3763_s7 + $0xe0] sm:$0xff] (!%p291_p9)  ;;  %v341_v10 = vsel (!%p291_p9), %vm337_vm1, 255, %v2483_v2  ;;  %vm579_vm3 = vcmp.lt.s32.totalorder (!%p291_p9), %v3005_v13, 16  ;;  %vm586_vm4 = vcmp.lt.s32.totalorder (!%p291_p9), %v3005_v13, 112 }
  0x15   : > { %s327_s27 = scalar_select %p326_p10, %s2942_s13, 1  ;;  %2653 = vmatpush3.bf16.msra.mxu0 %v3012_v15  ;;  %v3092_v39 = vpack.c.bf16 %v381_v37, %v380_v36  ;;  %v365_v41 = vld [vmem:[%s3763_s7 + $0x58] sm:$0xff]  ;;  %v383_v43 = vld [vmem:[%s3763_s7 + $0xe8] sm:$0xff]  ;;  %v366_v46 = vld [vmem:[%s3763_s7 + $0x60] sm:$0xff]  ;;  %v344_v12 = vcvt.s32.f32 %v2484_v5  ;;  %v343_v14 = vcvt.s32.f32 %v341_v10  ;;  %v3186_v19 = vsub.s32 1, %v563_v11 }
  0x16   : > { %2655 = vmatprep.subr.bf16.mxu0 %v3019_v18  ;;  %v3111_v44 = vpack.c.bf16 %v365_v41, %v364_v40  ;;  %v3114_v45 = vpack.c.bf16 %v383_v43, %v382_v42  ;;  %v367_v47 = vld [vmem:[%s3763_s7 + $0x68] sm:$0xff]  ;;  %v384_v48 = vld [vmem:[%s3763_s7 + $0xf0] sm:$0xff]  ;;  %v385_v49 = vld [vmem:[%s3763_s7 + $0xf8] sm:$0xff]  ;;  %v3188_v20 = vsub.s32 0, %v563_v11  ;;  %vm548_vm5 = vcmp.lt.s32.totalorder %v3005_v13, 17 }
  0x17   : > { %s2568_s14 = sshll.u32 %s327_s27, 3  ;;  %s2859_s27 = smov 1   ;;  %v3133_v50 = vpack.c.bf16 %v367_v47, %v366_v46  ;;  %v3136_v51 = vpack.c.bf16 %v385_v49, %v384_v48  ;;  %v368_v52 = vld [vmem:[%s3763_s7 + $0x70] sm:$0xff]  ;;  %v369_v53 = vld [vmem:[%s3763_s7 + $0x78] sm:$0xff]  ;;  %v2487_v3 = vld [vmem:[%s3764_s8 + $0x2] sm:$0x3] }
  0x18   : > { %345 = vrot.lane.b32.xlu0 %v335_v16, %s2859_s27  ;;  %s330_s16 = scalar_lea.vmem %s3756_s0, %s2568_s14  ;;  %s3766_s14 = smov 112   ;;  %v3149_v54 = vpack.c.bf16 %v369_v53, %v368_v52  ;;  %vm555_vm6 = vcmp.lt.s32.totalorder %v3005_v13, 111  ;;  %v560_v35 = vld [vmem:[%s3764_s8] sm:$0x3]  ;;  %v3223_v36 = vrot.slane %v2487_v3, %v3186_v19  ;;  %v3234_v41 = vrot.slane %v2487_v3, %v3188_v20 }
  0x19   : > { %v3056_v30 = vld [vmem:[%s330_s16] sm:$0xff]  ;;  %2657 = vmatpush3.bf16.msra.mxu0 %v3039_v24  ;;  %vm772_vm9 = vcmp.lt.s32.totalorder %v3005_v13, 15  ;;  %vm779_vm10 = vcmp.lt.s32.totalorder %v3005_v13, 113  ;;  %v3247_v47 = vrot.slane %v560_v35, %v3186_v19  ;;  %vm466_vm12 = vcmask 31744   ;;  %s3774_s16 = smov 112  }
  0x1a   : > { %v3061_v31 = vcombine.high %v3056_v30, %v3056_v30  ;;  %575 = vrot.lane.b32.xlu1 %v3056_v30, %s2860_s28  ;;  %2659 = vmatprep.subr.bf16.mxu0 %v3042_v25  ;;  %vm893_vm13 = vcmp.lt.s32.totalorder %v3005_v13, 127  ;;  %vm2401_vm1 = vcmask 523264  }
  0x1c   : > { %347 = vrot.lane.b32.xlu0 %v336_v23, %s2859_s27  ;;  %453 = vmatprep.mubr.f32.mxu0 %v3061_v31 }
  0x1d   : > { %2661 = vmatpush3.bf16.msra.mxu0 %v3066_v32 }
  0x1e   : > { %577 = vrot.lane.b32.xlu1 %v3061_v31, %s2860_s28  ;;  %2663 = vmatprep.subr.bf16.mxu0 %v3069_v33 }
  0x20   : > { %582 = vrot.lane.b32.xlu0 %v3056_v30, %s3766_s14 }
  0x21   : > { %2665 = vmatpush3.bf16.msra.mxu0 %v3089_v38 }
  0x22   : > { %584 = vrot.lane.b32.xlu1 %v3061_v31, %s3766_s14  ;;  %2667 = vmatprep.subr.bf16.mxu0 %v3092_v39  ;;  %s2863_s14 = smov 111  }
  0x24   : > { %544 = vrot.lane.b32.xlu0 %v3056_v30, %s2862_s25 }
  0x25   : > { %2669 = vmatpush3.bf16.msra.mxu0 %v3111_v44 }
  0x26   : > { %546 = vrot.lane.b32.xlu1 %v3061_v31, %s2862_s25  ;;  %2671 = vmatprep.subr.bf16.mxu0 %v3114_v45 }
  0x28   : > { %551 = vrot.lane.b32.xlu0 %v3056_v30, %s2863_s14 }
  0x29   : > { %2673 = vmatpush3.bf16.msra.mxu0 %v3133_v50 }
  0x2a   : > { %553 = vrot.lane.b32.xlu1 %v3061_v31, %s2863_s14  ;;  %2675 = vmatprep.subr.bf16.mxu0 %v3136_v51 }
  0x2c   : > { %768 = vrot.lane.b32.xlu0 %v3056_v30, %s2864_s21 }
  0x2d   : > { %2677 = vmatpush3.bf16.msra.mxu0 %v3149_v54 }
  0x2e   : > { %770 = vrot.lane.b32.xlu1 %v3061_v31, %s2864_s21 }
  0x30   : > { %775 = vrot.lane.b32.xlu0 %v3056_v30, %s2865_s22  ;;  %454 = vmatmul.mubr.f32.vlgmr.msra.gmra.mrb[0].mxu0 %v3056_v30 }
  0x31   : > { %1603 = vmatprep.mubr.f32.mxu0 %v2867_v55 }
  0x32   : > { %777 = vrot.lane.b32.xlu1 %v3061_v31, %s2865_s22 }
  0x34   : > { %883 = vrot.lane.b32.xlu0 %v3056_v30, %s2859_s27 }
  0x36   : > { %885 = vrot.lane.b32.xlu1 %v3061_v31, %s2859_s27 }
  0x38   : > { %889 = vrot.lane.b32.xlu0 %v3056_v30, %s2866_s23 }
  0x3a   : > { %891 = vrot.lane.b32.xlu1 %v3061_v31, %s2866_s23 }
  0x8a   : > { %v346_v56 = vpop.permute.xlu0 %345 }
  0x8c   : > { %v576_v57 = vpop.permute.xlu1 %575 }
  0x8e   : > { %v348_v58 = vpop.permute.xlu0 %347 }
  0x8f   : > { %v350_v16 = vsel %vm349_vm2, %v346_v56, %v348_v58  ;;  %v351_v17 = vsel %vm349_vm2, %v348_v58, %v346_v56  ;;  %v2495_v56 = vld [vmem:[%s3764_s8 + $0x4] sm:$0x3] }
  0x90   : > { %v578_v59 = vpop.permute.xlu1 %577  ;;  %vm3195_vm7 = vcmp.eq.f32.partialorder %v350_v16, %v344_v12  ;;  %vm3207_vm8 = vcmp.eq.f32.partialorder %v351_v17, %v343_v14  ;;  %v3289_v10 = vrot.slane %v2495_v56, %v3186_v19  ;;  %v2488_v12 = vld [vmem:[%s3757_s1 + $0x4] sm:$0xf] }
  0x91   : > { %v3201_v26 = vsel %vm579_vm3, %v576_v57, %v578_v59  ;;  %v3213_v29 = vsel %vm579_vm3, %v578_v59, %v576_v57 }
  0x92   : > { %v583_v60 = vpop.permute.xlu0 %582 }
  0x94   : > { %v585_v61 = vpop.permute.xlu1 %584 }
  0x95   : > { %v3205_v27 = vsel %vm586_vm4, %v585_v61, %v583_v60  ;;  %v3217_v34 = vsel %vm586_vm4, %v583_v60, %v585_v61  ;;  %v459_v60 = vld [vmem:[%s3761_s5] sm:$0xff] }
  0x96   : > { %v545_v62 = vpop.permute.xlu0 %544  ;;  %v590_v42 = vsel %vm3195_vm7, %v3201_v26, %v3205_v27  ;;  %v589_v46 = vsel %vm3207_vm8, %v3213_v29, %v3217_v34 }
  0x97   : > { %v605_v61 = vmul.f32 %v3223_v36, %v590_v42 }
  0x98   : > { %v547_v63 = vpop.permute.xlu1 %546 }
  0x99   : > { %v3227_v37 = vsel %vm548_vm5, %v545_v62, %v547_v63  ;;  %v3251_v49 = vsel %vm548_vm5, %v547_v63, %v545_v62 }
  0x9a   : > { %v552_v0 = vpop.permute.xlu0 %551 }
  0x9c   : > { %v554_v1 = vpop.permute.xlu1 %553 }
  0x9d   : > { %v3231_v40 = vsel %vm555_vm6, %v554_v1, %v552_v0  ;;  %v3255_v52 = vsel %vm555_vm6, %v552_v0, %v554_v1  ;;  %v604_v0 = vmul.f32 %v3234_v41, %v589_v46  ;;  %v3280_v1 = vrot.slane %v560_v35, %v3188_v20 }
  0x9e   : > { %v3174_v6 = vpop.permute.xlu0 %768  ;;  %v559_v53 = vsel %vm3195_vm7, %v3227_v37, %v3231_v40  ;;  %v558_v2 = vsel %vm3207_vm8, %v3251_v49, %v3255_v52 }
  0x9f   : > { %v573_v5 = vmul.f32 %v3247_v47, %v559_v53  ;;  %v572_v14 = vmul.f32 %v3280_v1, %v558_v2  ;;  %v574_v53 = vld [vmem:[%s3757_s1] sm:$0xf] }
  0xa0   : > { %v3176_v7 = vpop.permute.xlu1 %770 }
  0xa1   : > { %v3272_v62 = vsel %vm772_vm9, %v3174_v6, %v3176_v7  ;;  %v774_v35 = vsel %vm772_vm9, %v3176_v7, %v3174_v6  ;;  %v3324_v6 = vrot.slane %v2495_v56, %v3188_v20 }
  0xa2   : > { %v776_v21 = vpop.permute.xlu0 %775 }
  0xa4   : > { %v778_v22 = vpop.permute.xlu1 %777 }
  0xa5   : > { %v3276_v63 = vsel %vm779_vm10, %v778_v22, %v776_v21  ;;  %v780_v42 = vsel %vm779_vm10, %v776_v21, %v778_v22 }
  0xa6   : > { %v884_v57 = vpop.permute.xlu0 %883  ;;  %v783_v11 = vsel %vm3195_vm7, %v3272_v62, %v3276_v63  ;;  %v782_v7 = vsel %vm3207_vm8, %v774_v35, %v780_v42 }
  0xa7   : > { %v798_v3 = vmul.f32 %v3289_v10, %v783_v11 }
  0xa8   : > { %v886_v58 = vpop.permute.xlu1 %885 }
  0xa9   : > { %v887_v46 = vsel %vm349_vm2, %v884_v57, %v886_v58  ;;  %v888_v56 = vsel %vm349_vm2, %v886_v58, %v884_v57  ;;  %v2509_v58 = vld [vmem:[%s3764_s8 + $0xa] sm:$0x3] }
  0xaa   : > { %v890_v16 = vpop.permute.xlu0 %889  ;;  %v3364_v11 = vrot.slane %v2509_v58, %v3186_v19 }
  0xac   : > { %v892_v17 = vpop.permute.xlu1 %891 }
 0x103   : > { %v2601_v43 = vpop.f32.mrb[0].mxu0 }
 0x104   : > { %v2602_v48 = vpop.f32.mrb[1].mxu0 }
 0x105   : > { %v2603_v59 = vadd.f32 %v2602_v48, %v2601_v43  ;;  %v2500_v43 = vld [vmem:[%s3764_s8 + $0x6] sm:$0x3]  ;;  %v895_v48 = vsel %vm893_vm13, %v892_v17, %v890_v16 }
 0x106   : > { %v3329_v21 = vrot.slane %v2500_v43, %v3186_v19  ;;  %v897_v22 = vsel %vm3195_vm7, %v887_v46, %v895_v48 }
 0x107   : > { %2642 = vmatpush3.msk.msra.mxu1 %vm470_vm11, %v2603_v59  ;;  %v797_v59 = vmul.f32 %v3324_v6, %v782_v7 }
 0x108   : > { %2644 = vmatmul.mubr.msk.f32.vlgmr.msra.gmra.mrb[0].mxu1 %vm466_vm12, %v459_v60  ;;  %2489 = vmatprep.subr.msk.mxu1 %vm470_vm11, %v605_v61  ;;  %v912_v60 = vmul.f32 %v3329_v21, %v897_v22  ;;  %v894_v61 = vsel %vm893_vm13, %v890_v16, %v892_v17  ;;  %v2514_v17 = vld [vmem:[%s3764_s8 + $0xc] sm:$0x3]  ;;  %v2519_v22 = vld [vmem:[%s3764_s8 + $0xe] sm:$0x3] }
 0x109   : > { %2490 = vmatpush1.msk.msra.mxu1 %vm470_vm11, %v604_v0  ;;  %681 = vmatprep.mubr.f32.mxu1 %v2867_v55  ;;  %v3347_v0 = vrot.slane %v2500_v43, %v3188_v20  ;;  %v896_v2 = vsel %vm3207_vm8, %v888_v56, %v894_v61  ;;  %v1079_v43 = vsel %vm3207_vm8, %v894_v61, %v888_v56 }
 0x10a   : > { %2492 = vmatprep.subr.msk.mxu1 %vm470_vm11, %v573_v5  ;;  %v2496_v5 = vld [vmem:[%s3757_s1 + $0x8] sm:$0xf] }
 0x10b   : > { %v911_v57 = vmul.f32 %v3347_v0, %v896_v2  ;;  %v2524_v2 = vld [vmem:[%s3764_s8 + $0x10] sm:$0x3] }
 0x10c   : > { %2491 = vmatmul.mubr.msk.f32.vlgmr.msra.gmra.mrb[2].mxu1 %vm466_vm12, %v2488_v12  ;;  %v1080_v12 = vsel %vm3195_vm7, %v895_v48, %v887_v46  ;;  %v1181_v46 = vsel %vm3195_vm7, %v3276_v63, %v3272_v62  ;;  %v3405_v62 = vrot.slane %v2514_v17, %v3188_v20  ;;  %v3408_v63 = vrot.slane %v2519_v22, %v3186_v19 }
 0x10d   : > { %2493 = vmatpush1.msk.msra.mxu1 %vm470_vm11, %v572_v14  ;;  %761 = vmatprep.mubr.f32.mxu1 %v2867_v55  ;;  %v2501_v14 = vld [vmem:[%s3757_s1 + $0xc] sm:$0xf]  ;;  %v1095_v16 = vmul.f32 %v3364_v11, %v1080_v12 }
 0x10e   : > { %2497 = vmatprep.subr.msk.mxu1 %vm470_vm11, %v798_v3  ;;  %v3384_v3 = vrot.slane %v2514_v17, %v3186_v19 }
 0x110   : > { %v1196_v7 = vmul.f32 %v3384_v3, %v1181_v46 }
 0x114   : > { %2494 = vmatmul.mubr.msk.f32.vlgmr.msra.gmra.mrb[2].mxu1 %vm466_vm12, %v574_v53  ;;  %v1180_v53 = vsel %vm3207_vm8, %v780_v42, %v774_v35  ;;  %v3436_v35 = vrot.slane %v2524_v2, %v3186_v19  ;;  %v1383_v42 = vsel %vm3195_vm7, %v3231_v40, %v3227_v37  ;;  %v3452_v19 = vrot.slane %v2524_v2, %v3188_v20 }
 0x115   : > { %2498 = vmatpush1.msk.msra.mxu1 %vm470_vm11, %v797_v59  ;;  %874 = vmatprep.mubr.f32.mxu1 %v2867_v55  ;;  %v1282_v59 = vsel %vm3195_vm7, %v3205_v27, %v3201_v26  ;;  %v1195_v56 = vmul.f32 %v3405_v62, %v1180_v53  ;;  %v3429_v26 = vrot.slane %v2519_v22, %v3188_v20  ;;  %v2529_v22 = vld [vmem:[%s3759_s3 + $0x8] sm:$0xff] }
 0x116   : > { %2502 = vmatprep.subr.msk.mxu1 %vm470_vm11, %v912_v60  ;;  %v2510_v60 = vld [vmem:[%s3757_s1 + $0x14] sm:$0xf]  ;;  %v1297_v61 = vmul.f32 %v3408_v63, %v1282_v59  ;;  %v1281_v27 = vsel %vm3207_vm8, %v3217_v34, %v3213_v29  ;;  %v1382_v29 = vsel %vm3207_vm8, %v3255_v52, %v3251_v49  ;;  %v2520_v34 = vld [vmem:[%s3757_s1 + $0x1c] sm:$0xf] }
 0x117   : > { %v1397_v37 = vmul.f32 %v3452_v19, %v1382_v29 }
 0x11c   : > { %2499 = vmatmul.mubr.msk.f32.vlgmr.msra.gmra.mrb[2].mxu1 %vm466_vm12, %v2496_v5  ;;  %v2515_v5 = vld [vmem:[%s3757_s1 + $0x18] sm:$0xf] }
 0x11d   : > { %2503 = vmatpush1.msk.msra.mxu1 %vm470_vm11, %v911_v57  ;;  %988 = vmatprep.mubr.f32.mxu1 %v2867_v55  ;;  %v1296_v57 = vmul.f32 %v3429_v26, %v1281_v27 }
 0x11e   : > { %2506 = vmatprep.subr.msk.mxu1 %vm470_vm11, %v3061_v31  ;;  %v3381_v31 = vrot.slane %v2509_v58, %v3188_v20  ;;  %v1398_v58 = vmul.f32 %v3436_v35, %v1383_v42  ;;  %v2525_v20 = vld [vmem:[%s3757_s1 + $0x20] sm:$0xf] }
 0x120   : > { %v1094_v48 = vmul.f32 %v3381_v31, %v1079_v43 }
 0x124   : > { %2504 = vmatmul.mubr.msk.f32.vlgmr.msra.gmra.mrb[2].mxu1 %vm466_vm12, %v2501_v14 }
 0x125   : > { %2507 = vmatpush1.msk.msra.mxu1 %vm470_vm11, %v3056_v30  ;;  %1070 = vmatprep.mubr.f32.mxu1 %v2867_v55  ;;  %v2505_v30 = vld [vmem:[%s3757_s1 + $0x10] sm:$0xf] }
 0x126   : > { %2511 = vmatprep.subr.msk.mxu1 %vm470_vm11, %v1095_v16 }
 0x12c   : > { %2508 = vmatmul.mubr.msk.f32.vlgmr.msra.gmra.mrb[2].mxu1 %vm466_vm12, %v2505_v30 }
 0x12d   : > { %2512 = vmatpush1.msk.msra.mxu1 %vm470_vm11, %v1094_v48  ;;  %1171 = vmatprep.mubr.f32.mxu1 %v2867_v55 }
 0x12e   : > { %2516 = vmatprep.subr.msk.mxu1 %vm470_vm11, %v1196_v7 }
 0x134   : > { %2513 = vmatmul.mubr.msk.f32.vlgmr.msra.gmra.mrb[2].mxu1 %vm466_vm12, %v2510_v60 }
 0x135   : > { %2517 = vmatpush1.msk.msra.mxu1 %vm470_vm11, %v1195_v56  ;;  %1272 = vmatprep.mubr.f32.mxu1 %v2867_v55 }
 0x136   : > { %2521 = vmatprep.subr.msk.mxu1 %vm470_vm11, %v1297_v61 }
 0x13c   : > { %2518 = vmatmul.mubr.msk.f32.vlgmr.msra.gmra.mrb[2].mxu1 %vm466_vm12, %v2515_v5 }
 0x13d   : > { %2522 = vmatpush1.msk.msra.mxu1 %vm470_vm11, %v1296_v57  ;;  %1373 = vmatprep.mubr.f32.mxu1 %v2867_v55 }
 0x13e   : > { %2526 = vmatprep.subr.msk.mxu1 %vm470_vm11, %v1398_v58  ;;  %v1511_v58 = vld [vmem:[%s3759_s3] sm:$0xff] }
 0x144   : > { %2523 = vmatmul.mubr.msk.f32.vlgmr.msra.gmra.mrb[2].mxu1 %vm466_vm12, %v2520_v34 }
 0x145   : > { %2527 = vmatpush1.msk.msra.mxu1 %vm470_vm11, %v1397_v37  ;;  %1474 = vmatprep.mubr.f32.mxu1 %v2867_v55 }
 0x146   : > { %2679 = vmatprep.subr.bf16.mxu1 %v2979_v4  ;;  %v2869_v4 = vmov 0  }
 0x147   : > { %2792 = vset.pattern.permute.xlu0 %v2869_v4 }
 0x14c   : > { %2528 = vmatmul.mubr.msk.f32.vlgmr.msra.gmra.mrb[2].mxu1 %vm466_vm12, %v2525_v20 }
 0x14d   : > { %2681 = vmatpush3.bf16.msra.mxu1 %v2990_v8 }
 0x14e   : > { %2683 = vmatprep.subr.bf16.mxu1 %v2992_v9 }
 0x151   : > { %2685 = vmatpush3.bf16.msra.mxu1 %v3012_v15  ;;  %v1483_v15 = vld [vmem:[%s3758_s2] sm:$0xff] }
 0x152   : > { %2687 = vmatprep.subr.bf16.mxu1 %v3019_v18  ;;  %v1485_v18 = vcombine.high %v1483_v15, %v1483_v15 }
 0x155   : > { %2689 = vmatpush3.bf16.msra.mxu1 %v3039_v24 }
 0x156   : > { %2691 = vmatprep.subr.bf16.mxu1 %v3042_v25 }
 0x159   : > { %2693 = vmatpush3.bf16.msra.mxu1 %v3066_v32 }
 0x15a   : > { %2695 = vmatprep.subr.bf16.mxu1 %v3069_v33 }
 0x15d   : > { %2697 = vmatpush3.bf16.msra.mxu1 %v3089_v38 }
 0x15e   : > { %2699 = vmatprep.subr.bf16.mxu1 %v3092_v39 }
 0x161   : > { %2701 = vmatpush3.bf16.msra.mxu1 %v3111_v44 }
 0x162   : > { %2703 = vmatprep.subr.bf16.mxu1 %v3114_v45 }
 0x165   : > { %2705 = vmatpush3.bf16.msra.mxu1 %v3133_v50  ;;  %v460_v50 = vld [vmem:[%s3762_s6] sm:$0xff] }
 0x166   : > { %2707 = vmatprep.subr.bf16.mxu1 %v3136_v51 }
 0x169   : > { %2709 = vmatpush3.bf16.msra.mxu1 %v3149_v54 }
 0x1db   : > { %v3485_v8 = vpop.f32.mrb[0].mxu1 }
 0x1dc   : > { %v2645_v9 = vpop.f32.mrb[1].mxu1 }
 0x21f   : > { %v1476_v24 = vpop.f32.mrb[2].mxu1 }
 0x220   : > { %v1487_v25 = vadd.f32 %v1483_v15, %v1476_v24  ;;  %v1478_v32 = vpop.f32.mrb[3].mxu1 }
 0x221   : > { %v1488_v33 = vadd.f32 %v1485_v18, %v1478_v32  ;;  %v2536_v32 = vld [vmem:[%s3759_s3 + $0x10] sm:$0xff] }
 0x222   : > { %vm1489_vm14 = vcmp.ge.f32.partialorder %v1487_v25, 0.0  ;;  %v1491_v38 = vmul.f32 0.2, %v1487_v25 }
 0x223   : > { %vm1490_vm15 = vcmp.ge.f32.partialorder %v1488_v33, 0.0  ;;  %v1492_v39 = vmul.f32 0.2, %v1488_v33 }
 0x224   : > { %v3490_v44 = vsel %vm1489_vm14, %v1487_v25, %v1491_v38 }
 0x225   : > { %v3492_v45 = vsel %vm1490_vm15, %v1488_v33, %v1492_v39  ;;  %1512 = vrot.lane.b32.xlu0 %v3490_v44, %s2860_s28 }
 0x226   : > { %1514 = vrot.lane.b32.xlu1 %v3492_v45, %s2860_s28  ;;  %s2565_s28 = sshll.u32 %s2942_s13, 7 }
 0x229   : > { %1518 = vrot.lane.b32.xlu0 %v3490_v44, %s3774_s16 }
 0x22a   : > { %1520 = vrot.lane.b32.xlu1 %v3492_v45, %s3774_s16 }
 0x22d   : > { %1495 = vrot.lane.b32.xlu0 %v3490_v44, %s2862_s25 }
 0x22e   : > { %1497 = vrot.lane.b32.xlu1 %v3492_v45, %s2862_s25 }
 0x231   : > { %1501 = vrot.lane.b32.xlu0 %v3490_v44, %s2863_s14 }
 0x232   : > { %1503 = vrot.lane.b32.xlu1 %v3492_v45, %s2863_s14  ;;  %s325_s14 = scalar_lea.vmem [#allocation2], %s2480_s26  ;;  %s2799_s26 = sshll.u32 %s2870_s17, 4  ;;  %s2800_s26 = int_to_ptr.vmem [resolvable:$false] %s2799_s26 }
 0x233   : > { %s2801_s29 = scalar_lea.vmem %s2800_s26, 256 }
 0x235   : > { %1690 = vrot.lane.b32.xlu0 %v3490_v44, %s2864_s21 }
 0x236   : > { %1692 = vrot.lane.b32.xlu1 %v3492_v45, %s2864_s21 }
 0x239   : > { %1696 = vrot.lane.b32.xlu0 %v3490_v44, %s2865_s22 }
 0x23a   : > { %1698 = vrot.lane.b32.xlu1 %v3492_v45, %s2865_s22  ;;  %s3714_s22 = scalar_lea.hbm %s3765_s9, %s2565_s28 }
 0x23d   : > { %1790 = vrot.lane.b32.xlu0 %v3490_v44, %s2859_s27 }
 0x23e   : > { %1792 = vrot.lane.b32.xlu1 %v3492_v45, %s2859_s27  ;;  %s2417_s27 = sshll.u32 %s325_s14, 4  ;;  %s3716_s27 = int_to_ptr.vmem [resolvable:$true] %s2417_s27 }
 0x23f   : > { %s2795_s13 = scalar_lea.vmem %s3716_s27, 128  ;;  %p2802_p0 = scmp.lt.s32.totalorder %s3716_s27, %s2800_s26 }
 0x240   : > { %p2796_p11 = scmp.ne.s32.totalorder %s3716_s27, %s2795_s13  ;;  %p2803_p1 = scmp.lt.s32.totalorder %s2801_s29, %s2795_s13 }
 0x241   : > { %1796 = vrot.lane.b32.xlu0 %v3490_v44, %s2866_s23 }
 0x242   : > { %1798 = vrot.lane.b32.xlu1 %v3492_v45, %s2866_s23  ;;  %s2404_s23 = scalar_lea.sflag [#allocation3], %s323_s24  ;;  %p2797_p12 = pnand %p2796_p11, %p2959_p5 }
 0x243   : > { %p2804_p2 = por %p2803_p1, %p2802_p0 }
 0x244   : > { %p2798_p13 = pneg %p2797_p12 }
 0x245   : > { %463 = vperm.xlu0 %2792, %v460_v50  }
 0x246   : > { %p2805_p3 = pnand %p2804_p2, %p2798_p13 }
 0x297   : > { %v1513_v51 = vpop.permute.xlu0 %1512 }
 0x298   : > { %v1515_v54 = vpop.permute.xlu1 %1514 }
 0x299   : > { %v3531_v52 = vsel %vm579_vm3, %v1513_v51, %v1515_v54  ;;  %v3535_v12 = vsel %vm579_vm3, %v1515_v54, %v1513_v51 }
 0x29b   : > { %v1519_v40 = vpop.permute.xlu0 %1518 }
 0x29c   : > { %v1521_v49 = vpop.permute.xlu1 %1520 }
 0x29d   : > { %v3539_v14 = vsel %vm586_vm4, %v1519_v40, %v1521_v49  ;;  %v3543_v16 = vsel %vm586_vm4, %v1521_v49, %v1519_v40 }
 0x29e   : > { %v1524_v17 = vsel %vm3207_vm8, %v3535_v12, %v3539_v14  ;;  %v1525_v43 = vsel %vm3195_vm7, %v3531_v52, %v3543_v16 }
 0x29f   : > { %v1526_v46 = vmul.f32 %v1524_v17, %v3234_v41  ;;  %v1527_v30 = vmul.f32 %v1525_v43, %v3223_v36  ;;  %v1496_v48 = vpop.permute.xlu0 %1495  ;;  %v2540_v43 = vld [vmem:[%s3759_s3 + $0x18] sm:$0xff] }
 0x2a0   : > { %v1498_v7 = vpop.permute.xlu1 %1497 }
 0x2a1   : > { %2530 = vmatprep.subr.msk.mxu0 %vm470_vm11, %v1527_v30  ;;  %v3564_v41 = vsel %vm548_vm5, %v1496_v48, %v1498_v7  ;;  %v3568_v36 = vsel %vm548_vm5, %v1498_v7, %v1496_v48  ;;  %v2151_v30 = vsel %vm3195_vm7, %v3543_v16, %v3531_v52  ;;  %v2150_v52 = vsel %vm3207_vm8, %v3539_v14, %v3535_v12  ;;  %v2560_v12 = vld [vmem:[%s3759_s3 + $0x40] sm:$0xff] }
 0x2a2   : > { %2531 = vmatpush1.msk.msra.mxu0 %vm470_vm11, %v1526_v46  ;;  %v2153_v48 = vmul.f32 %v2151_v30, %v3408_v63  ;;  %v2552_v63 = vld [vmem:[%s3759_s3 + $0x30] sm:$0xff]  ;;  %v2152_v16 = vmul.f32 %v2150_v52, %v3429_v26  ;;  %v2556_v26 = vld [vmem:[%s3759_s3 + $0x38] sm:$0xff] }
 0x2a3   : > { %v1502_v53 = vpop.permute.xlu0 %1501  ;;  %2532 = vmatmul.mubr.msk.f32.vlgmr.msra.gmra.mrb[2].mxu0 %vm466_vm12, %v2529_v22 }
 0x2a4   : > { %v1504_v59 = vpop.permute.xlu1 %1503  ;;  %1683 = vmatprep.mubr.f32.mxu0 %v2867_v55 }
 0x2a5   : > { %v3572_v60 = vsel %vm555_vm6, %v1502_v53, %v1504_v59  ;;  %v3576_v56 = vsel %vm555_vm6, %v1504_v59, %v1502_v53 }
 0x2a6   : > { %v1507_v61 = vsel %vm3207_vm8, %v3568_v36, %v3572_v60  ;;  %v1508_v2 = vsel %vm3195_vm7, %v3564_v41, %v3576_v56  ;;  %v2238_v23 = vsel %vm3207_vm8, %v3572_v60, %v3568_v36 }
 0x2a7   : > { %v1509_v27 = vmul.f32 %v1507_v61, %v3280_v1  ;;  %v1510_v42 = vmul.f32 %v1508_v2, %v3247_v47  ;;  %v1691_v5 = vpop.permute.xlu0 %1690 }
 0x2a8   : > { %v1693_v57 = vpop.permute.xlu1 %1692 }
 0x2a9   : > { %2533 = vmatprep.subr.msk.mxu0 %vm470_vm11, %v1510_v42  ;;  %v1694_v1 = vsel %vm772_vm9, %v1691_v5, %v1693_v57  ;;  %v1695_v47 = vsel %vm772_vm9, %v1693_v57, %v1691_v5 }
 0x2aa   : > { %2534 = vmatpush1.msk.msra.mxu0 %vm470_vm11, %v1509_v27 }
 0x2ab   : > { %v1697_v29 = vpop.permute.xlu0 %1696  ;;  %2535 = vmatmul.mubr.msk.f32.vlgmr.msra.gmra.mrb[2].mxu0 %vm466_vm12, %v1511_v58 }
 0x2ac   : > { %v1699_v34 = vpop.permute.xlu1 %1698  ;;  %1781 = vmatprep.mubr.f32.mxu0 %v2867_v55 }
 0x2ad   : > { %v1700_v37 = vsel %vm779_vm10, %v1697_v29, %v1699_v34  ;;  %v1701_v20 = vsel %vm779_vm10, %v1699_v34, %v1697_v29 }
 0x2ae   : > { %v1702_v4 = vsel %vm3207_vm8, %v1695_v47, %v1700_v37  ;;  %v1703_v9 = vsel %vm3195_vm7, %v1694_v1, %v1701_v20 }
 0x2af   : > { %v1704_v15 = vmul.f32 %v1702_v4, %v3324_v6  ;;  %v1705_v18 = vmul.f32 %v1703_v9, %v3289_v10  ;;  %v1791_v24 = vpop.permute.xlu0 %1790 }
 0x2b0   : > { %v1793_v25 = vpop.permute.xlu1 %1792 }
 0x2b1   : > { %2537 = vmatprep.subr.msk.mxu0 %vm470_vm11, %v1705_v18  ;;  %v1794_v6 = vsel %vm349_vm2, %v1791_v24, %v1793_v25  ;;  %v1795_v10 = vsel %vm349_vm2, %v1793_v25, %v1791_v24 }
 0x2b2   : > { %2538 = vmatpush1.msk.msra.mxu0 %vm470_vm11, %v1704_v15 }
 0x2b3   : > { %v1797_v33 = vpop.permute.xlu0 %1796  ;;  %2539 = vmatmul.mubr.msk.f32.vlgmr.msra.gmra.mrb[2].mxu0 %vm466_vm12, %v2536_v32 }
 0x2b4   : > { %v1799_v38 = vpop.permute.xlu1 %1798  ;;  %1881 = vmatprep.mubr.f32.mxu0 %v2867_v55 }
 0x2b5   : > { %v1800_v39 = vsel %vm893_vm13, %v1797_v33, %v1799_v38  ;;  %v1801_v50 = vsel %vm893_vm13, %v1799_v38, %v1797_v33 }
 0x2b6   : > { %v1802_v51 = vsel %vm3207_vm8, %v1795_v10, %v1800_v39  ;;  %v1803_v54 = vsel %vm3195_vm7, %v1794_v6, %v1801_v50  ;;  %v1975_v17 = vsel %vm3195_vm7, %v1801_v50, %v1794_v6 }
 0x2b7   : > { %v1804_v40 = vmul.f32 %v1802_v51, %v3347_v0  ;;  %v1805_v49 = vmul.f32 %v1803_v54, %v3329_v21  ;;  %v1977_v13 = vmul.f32 %v1975_v17, %v3364_v11  ;;  %v1974_v21 = vsel %vm3207_vm8, %v1800_v39, %v1795_v10  ;;  %v2544_v11 = vld [vmem:[%s3759_s3 + $0x20] sm:$0xff] }
 0x2b8   : > { %v2063_v0 = vsel %vm3195_vm7, %v1701_v20, %v1694_v1  ;;  %v1976_v46 = vmul.f32 %v1974_v21, %v3381_v31  ;;  %v2548_v31 = vld [vmem:[%s3759_s3 + $0x28] sm:$0xff] }
 0x2b9   : > { %2541 = vmatprep.subr.msk.mxu0 %vm470_vm11, %v1805_v49 }
 0x2ba   : > { %2542 = vmatpush1.msk.msra.mxu0 %vm470_vm11, %v1804_v40 }
 0x2bb   : > { %2543 = vmatmul.mubr.msk.f32.vlgmr.msra.gmra.mrb[2].mxu0 %vm466_vm12, %v2540_v43  ;;  %2545 = vmatprep.subr.msk.mxu0 %vm470_vm11, %v3492_v45  ;;  %v2065_v45 = vmul.f32 %v2063_v0, %v3384_v3 }
 0x2bc   : > { %2546 = vmatpush1.msk.msra.mxu0 %vm470_vm11, %v3490_v44  ;;  %1965 = vmatprep.mubr.f32.mxu0 %v2867_v55  ;;  %v2062_v44 = vsel %vm3207_vm8, %v1700_v37, %v1695_v47 }
 0x2bd   : > { %2549 = vmatprep.subr.msk.mxu0 %vm470_vm11, %v1977_v13  ;;  %v2064_v3 = vmul.f32 %v2062_v44, %v3405_v62  ;;  %v2239_v62 = vsel %vm3195_vm7, %v3576_v56, %v3564_v41 }
 0x2be   : > { %v2241_v7 = vmul.f32 %v2239_v62, %v3436_v35  ;;  %v2240_v35 = vmul.f32 %v2238_v23, %v3452_v19  ;;  %v2326_v19 = vld [vmem:[%s3760_s4] sm:$0xff] }
 0x2c3   : > { %2547 = vmatmul.mubr.msk.f32.vlgmr.msra.gmra.mrb[2].mxu0 %vm466_vm12, %v2544_v11 }
 0x2c4   : > { %2550 = vmatpush1.msk.msra.mxu0 %vm470_vm11, %v1976_v46  ;;  %2053 = vmatprep.mubr.f32.mxu0 %v2867_v55  ;;  %v464_v59 = vpop.permute.xlu0 %463 }
 0x2c5   : > { %2553 = vmatprep.subr.msk.mxu0 %vm470_vm11, %v2065_v45  ;;  %v541_v60 = vadd.f32 %v3485_v8, %v464_v59 }
 0x2cb   : > { %2551 = vmatmul.mubr.msk.f32.vlgmr.msra.gmra.mrb[2].mxu0 %vm466_vm12, %v2548_v31 }
 0x2cc   : > { %2554 = vmatpush1.msk.msra.mxu0 %vm470_vm11, %v2064_v3  ;;  %2141 = vmatprep.mubr.f32.mxu0 %v2867_v55 }
 0x2cd   : > { %2557 = vmatprep.subr.msk.mxu0 %vm470_vm11, %v2153_v48 }
 0x2d3   : > { %2555 = vmatmul.mubr.msk.f32.vlgmr.msra.gmra.mrb[2].mxu0 %vm466_vm12, %v2552_v63 }
 0x2d4   : > { %2558 = vmatpush1.msk.msra.mxu0 %vm470_vm11, %v2152_v16  ;;  %2229 = vmatprep.mubr.f32.mxu0 %v2867_v55 }
 0x2d5   : > { %2561 = vmatprep.subr.msk.mxu0 %vm470_vm11, %v2241_v7 }
 0x2db   : > { %2559 = vmatmul.mubr.msk.f32.vlgmr.msra.gmra.mrb[2].mxu0 %vm466_vm12, %v2556_v26 }
 0x2dc   : > { %2562 = vmatpush1.msk.msra.mxu0 %vm470_vm11, %v2240_v35  ;;  %2317 = vmatprep.mubr.f32.mxu0 %v2867_v55 }
 0x2e3   : > { %2563 = vmatmul.mubr.msk.f32.vlgmr.msra.gmra.mrb[2].mxu0 %vm466_vm12, %v2560_v12 }
 0x3b6   : > { %v2319_v28 = vpop.f32.mrb[2].mxu0 }
 0x3b7   : > { %v2321_v14 = vpop.f32.mrb[3].mxu0 }
 0x3b8   : > { %2391 = vmatprep.mubr.f32.mxu1 %v2321_v14 }
 0x3b9   : > { %2392 = vmatmul.mubr.f32.vlgmr.msra.gmra.mrb[4].mxu1 %v2319_v28 }
 0x48c   : > { %v2638_v22 = vpop.f32.mrb[4].mxu1 }
 0x48d   : > { %v2639_v53 = vpop.f32.mrb[5].mxu1 }
 0x48e   : > { %v2640_v55 = vadd.f32 %v2639_v53, %v2638_v22 }
 0x490   : > { %v2394_v41 = vadd.f32 %v2640_v55, %v2326_v19 }
 0x492   : > { %vm2397_vm0 = vcmp.ge.f32.partialorder %v2394_v41, 0.0  ;;  %v2398_v36 = vmul.f32 0.2, %v2394_v41 }
 0x494   : > { %v2399_v56 = vsel %vm2397_vm0, %v2394_v41, %v2398_v36 }
 0x495   : > { %v2400_v61 = vadd.f32 %v2399_v56, %v541_v60 }
 0x497   : > { %2402 = vst.msk [vmem:[%s325_s14] sm:$0xff] %vm2401_vm1, %v2400_v61 }
 0x498   : > { %2808 = shalt.err (!%p2805_p3)
}
 0x499   : > { %s2809_s24 = scalar_lea.hbm %s3714_s22, 128  ;;  %s2813_s14 = scalar_lea.hbm %s3765_s9, 256 }
 0x49a   : > { %p2810_p4 = scmp.ne.s32.totalorder %s3714_s22, %s2809_s24  ;;  %p2814_p9 = scmp.lt.u32.totalorder %s3714_s22, %s3765_s9 }
 0x49b   : > { %p2815_p10 = scmp.lt.u32.totalorder %s2813_s14, %s2809_s24  ;;  %p2817_p12 = scmp.lt.u32.totalorder %s2809_s24, %s3714_s22 }
 0x49c   : > { %p2811_p7 = pnand %p2810_p4, %p2959_p5 }
 0x49d   : > { %p2816_p11 = por %p2815_p10, %p2814_p9 }
 0x49e   : > { %p2812_p8 = pneg %p2811_p7 }
 0x49f   : > { %p2818_p13 = por %p2817_p12, %p2816_p11 }
 0x4a1   : > { %p2819_p0 = pnand %p2818_p13, %p2812_p8 }
 0x4a3   : > { %2822 = shalt.err (!%p2819_p0)
}
 0x4a4   : > { %2742 = dma.vmem_to_hbm [thread:$0]  (%p2959_p5), %s3716_s27, 128, %s3714_s22, %s2404_s23  }
 0x4a5 PF: > { %p2748_p1 = scmp.ge.s32.totalorder %s2857_s12, 2  ;;  %s2429_s13 = sand.u32 1, %s2845_s30  }
 0x4a6   : > { %s2430_s17 = scalar_lea.sflag [#allocation3], %s2429_s13 }
 0x4a7   : > { %p2745_p2 = pnand %p2748_p1, %p2963_p6 }
 0x4a9   : > { %2840 = dma.done.wait (!%p2745_p2), %s2430_s17, 128  }
 0x4aa   : > { %2842 = vsyncadd (!%p2745_p2), %s2430_s17, 4294967168  ;;  %p19_p3 = scmp.ge.s32.totalorder %s2946_s15, 4   ;;  %s3775_s30 = smov %s2849_s10 }
 0x4ab   : > { %s3776_s10 = smov %s2853_s11  ;;  %s3777_s11 = smov %s2957_s18 }
 0x4ac   : > { %s3778_s12 = smov %s2946_s15  ;;  %21 = sbr.rel (!%p19_p3) target bundleno = 3 (0x3), region = 114 }
 0x4b3   :  { %2435 = vsyncpa [#allocation3], 1 }
 0x4b4   :  { %2437 = vsyncpa [#allocation3 + $0x1], 1 }

</bundles_post_ra>
